<compile_context>
chip_gen: v5e
topology: v5e:2x2
jax: 0.10.0
libtpu: 0.0.40
codegen_flags: <defaults>
</compile_context>

<pallas_src>
import functools

import jax
import jax.numpy as jnp
from jax.experimental import pallas as pl
from jax.experimental.pallas import tpu as pltpu

EPS = 1e-5
LANE = 128                       # channel / K dims padded to this (lane-dense)
VMEM_LIMIT = 48 * 1024 * 1024    # <= v7x 64 MiB physical; ample on v5e/v6e


# ---------------------------------------------------------------------------
# Helpers
# ---------------------------------------------------------------------------
def _round_up(x, m):
    return (x + m - 1) // m * m


def _pad2d(a, rows, cols):
    return jnp.pad(a, ((0, rows - a.shape[0]), (0, cols - a.shape[1])))


# ---------------------------------------------------------------------------
# Kernel 1: implicit-GEMM stride-1 3x3 conv + per-sample BN partial stats.
# One grid step = one batch sample (no halo across grid steps).
# ---------------------------------------------------------------------------
def conv3x3s1_stats_kernel(xp_ref, w_ref, z_ref, s_ref, *, ho, wo):
    # xp_ref: (1, H+2, W+2, Cin) bf16 (spatially pre-padded)
    # w_ref:  (9, Cin, Cp) bf16, VMEM-resident across the whole grid
    cin = xp_ref.shape[-1]
    acc = None
    for t in range(9):
        kh, kw = t // 3, t % 3
        lhs = xp_ref[0, kh:kh + ho, kw:kw + wo, :].reshape(ho * wo, cin)
        d = jnp.dot(lhs, w_ref[t], preferred_element_type=jnp.float32)
        acc = d if acc is None else acc + d
    z_ref[0] = acc.astype(z_ref.dtype)                       # bf16 to HBM
    ssum = jnp.sum(acc, axis=0, keepdims=True)                # (1, Cp)
    ssq = jnp.sum(acc * acc, axis=0, keepdims=True)           # (1, Cp)
    s_ref[0] = jnp.concatenate([ssum, ssq], axis=0)


def conv3x3s1_stats(xp_bf16, w9_bf16, ho, wo):
    n, hp, wp, cin = xp_bf16.shape
    cp = w9_bf16.shape[-1]
    m = ho * wo
    flops = 2 * n * m * 9 * cin * cp
    bytes_accessed = int(xp_bf16.size * 2 + w9_bf16.size * 2
                         + n * m * cp * 2 + n * 2 * cp * 4)
    kern = functools.partial(conv3x3s1_stats_kernel, ho=ho, wo=wo)
    return pl.pallas_call(
        kern,
        out_shape=(jax.ShapeDtypeStruct((n, m, cp), jnp.bfloat16),
                   jax.ShapeDtypeStruct((n, 2, cp), jnp.float32)),
        grid_spec=pltpu.PrefetchScalarGridSpec(
            num_scalar_prefetch=0,
            grid=(n,),
            in_specs=[pl.BlockSpec((1, hp, wp, cin), lambda i: (i, 0, 0, 0)),
                      pl.BlockSpec((9, cin, cp), lambda i: (0, 0, 0))],
            out_specs=[pl.BlockSpec((1, m, cp), lambda i: (i, 0, 0)),
                       pl.BlockSpec((1, 2, cp), lambda i: (i, 0, 0))]),
        compiler_params=pltpu.CompilerParams(
            dimension_semantics=("parallel",),
            vmem_limit_bytes=VMEM_LIMIT),
        cost_estimate=pl.CostEstimate(flops=int(flops), transcendentals=0,
                                      bytes_accessed=bytes_accessed),
    )(xp_bf16, w9_bf16)


# ---------------------------------------------------------------------------
# Kernel 2: per-sample GEMM + BN partial stats (stride-2 conv1 patches and the
# 1x1 stride-2 downsample conv).  Weights are one VMEM-resident full-K block.
# ---------------------------------------------------------------------------
def gemm_stats_kernel(p_ref, w_ref, z_ref, s_ref):
    acc = jnp.dot(p_ref[0], w_ref[...], preferred_element_type=jnp.float32)
    z_ref[0] = acc.astype(z_ref.dtype)
    ssum = jnp.sum(acc, axis=0, keepdims=True)
    ssq = jnp.sum(acc * acc, axis=0, keepdims=True)
    s_ref[0] = jnp.concatenate([ssum, ssq], axis=0)


def gemm_stats(p_bf16, w_bf16):
    n, m, kp = p_bf16.shape
    cp = w_bf16.shape[-1]
    flops = 2 * n * m * kp * cp
    bytes_accessed = int(p_bf16.size * 2 + w_bf16.size * 2
                         + n * m * cp * 2 + n * 2 * cp * 4)
    return pl.pallas_call(
        gemm_stats_kernel,
        out_shape=(jax.ShapeDtypeStruct((n, m, cp), jnp.bfloat16),
                   jax.ShapeDtypeStruct((n, 2, cp), jnp.float32)),
        grid_spec=pltpu.PrefetchScalarGridSpec(
            num_scalar_prefetch=0,
            grid=(n,),
            in_specs=[pl.BlockSpec((1, m, kp), lambda i: (i, 0, 0)),
                      pl.BlockSpec((kp, cp), lambda i: (0, 0))],
            out_specs=[pl.BlockSpec((1, m, cp), lambda i: (i, 0, 0)),
                       pl.BlockSpec((1, 2, cp), lambda i: (i, 0, 0))]),
        compiler_params=pltpu.CompilerParams(
            dimension_semantics=("parallel",),
            vmem_limit_bytes=VMEM_LIMIT),
        cost_estimate=pl.CostEstimate(flops=int(flops), transcendentals=0,
                                      bytes_accessed=bytes_accessed),
    )(p_bf16, w_bf16)


# ---------------------------------------------------------------------------
# Kernel 3: epilogues.  bn1+relu writes a spatially padded bf16 tensor that
# conv2 consumes directly; the final epilogues fuse BN affine + residual +
# ReLU and emit f32.
# ---------------------------------------------------------------------------
def bn_relu_pad_kernel(z_ref, sc_ref, sh_ref, o_ref, *, ho, wo):
    cp = z_ref.shape[-1]
    y = jnp.maximum(z_ref[0].astype(jnp.float32) * sc_ref[...] + sh_ref[...], 0.0)
    y = y.reshape(ho, wo, cp).astype(o_ref.dtype)
    zc = jnp.zeros((ho, 1, cp), o_ref.dtype)
    zr = jnp.zeros((1, wo + 2, cp), o_ref.dtype)
    y = jnp.concatenate([zc, y, zc], axis=1)          # pad W by 1 each side
    y = jnp.concatenate([zr, y, zr], axis=0)          # pad H by 1 each side
    o_ref[0] = y


def bn_relu_pad(z, sc, sh, ho, wo):
    n, m, cp = z.shape
    kern = functools.partial(bn_relu_pad_kernel, ho=ho, wo=wo)
    bytes_accessed = int(z.size * 2 + 2 * cp * 4 + n * (ho + 2) * (wo + 2) * cp * 2)
    return pl.pallas_call(
        kern,
        out_shape=jax.ShapeDtypeStruct((n, ho + 2, wo + 2, cp), jnp.bfloat16),
        grid_spec=pltpu.PrefetchScalarGridSpec(
            num_scalar_prefetch=0,
            grid=(n,),
            in_specs=[pl.BlockSpec((1, m, cp), lambda i: (i, 0, 0)),
                      pl.BlockSpec((1, cp), lambda i: (0, 0)),
                      pl.BlockSpec((1, cp), lambda i: (0, 0))],
            out_specs=pl.BlockSpec((1, ho + 2, wo + 2, cp),
                                   lambda i: (i, 0, 0, 0))),
        compiler_params=pltpu.CompilerParams(
            dimension_semantics=("parallel",),
            vmem_limit_bytes=VMEM_LIMIT),
        cost_estimate=pl.CostEstimate(flops=3 * n * m * cp, transcendentals=0,
                                      bytes_accessed=bytes_accessed),
    )(z, sc, sh)


def bn_add_relu_kernel(z_ref, sc_ref, sh_ref, r_ref, o_ref):
    y = z_ref[0].astype(jnp.float32) * sc_ref[...] + sh_ref[...]
    y = y + r_ref[0].astype(jnp.float32)
    o_ref[0] = jnp.maximum(y, 0.0)


def bn_add_bn_relu_kernel(z_ref, sc_ref, sh_ref, zd_ref, scd_ref, shd_ref, o_ref):
    y = z_ref[0].astype(jnp.float32) * sc_ref[...] + sh_ref[...]
    y = y + zd_ref[0].astype(jnp.float32) * scd_ref[...] + shd_ref[...]
    o_ref[0] = jnp.maximum(y, 0.0)


def _epilogue(kernel, *args):
    n, m, cp = args[0].shape

    def spec(a):
        if a.ndim == 2:                                # per-channel (1, Cp)
            return pl.BlockSpec((1, cp), lambda i: (0, 0))
        return pl.BlockSpec((1, m, cp), lambda i: (i, 0, 0))

    bytes_accessed = int(sum(int(a.size) * a.dtype.itemsize for a in args)
                         + n * m * cp * 4)
    return pl.pallas_call(
        kernel,
        out_shape=jax.ShapeDtypeStruct((n, m, cp), jnp.float32),
        grid_spec=pltpu.PrefetchScalarGridSpec(
            num_scalar_prefetch=0,
            grid=(n,),
            in_specs=[spec(a) for a in args],
            out_specs=pl.BlockSpec((1, m, cp), lambda i: (i, 0, 0))),
        compiler_params=pltpu.CompilerParams(
            dimension_semantics=("parallel",),
            vmem_limit_bytes=VMEM_LIMIT),
        cost_estimate=pl.CostEstimate(flops=6 * n * m * cp, transcendentals=0,
                                      bytes_accessed=bytes_accessed),
    )(*args)


# ---------------------------------------------------------------------------
# JAX glue: im2col (stride-2 conv1 only), BN statistics finalization, forward.
# ---------------------------------------------------------------------------
def im2col_3x3(x_nhwc, stride):
    """3x3 conv, pad=1.  Returns (N, Ho*Wo, 9*C) patches and (Ho, Wo)."""
    n, h, w, c = x_nhwc.shape
    xp = jnp.pad(x_nhwc, ((0, 0), (1, 1), (1, 1), (0, 0)))
    ho = (h + 2 - 3) // stride + 1
    wo = (w + 2 - 3) // stride + 1
    cols = [xp[:, kh:kh + stride * ho:stride, kw:kw + stride * wo:stride, :]
            for kh in range(3) for kw in range(3)]
    patches = jnp.concatenate(cols, axis=-1)            # (N, Ho, Wo, 9*C)
    return patches.reshape(n, ho * wo, 9 * c), (ho, wo)


def _bn_scale_shift(stats, m_real, gamma, beta, cp):
    """Training-mode BN (biased variance) from per-sample partial sums."""
    tot = jnp.sum(stats, axis=0)                         # (2, Cp)
    mean = tot[0] / m_real
    var = jnp.maximum(tot[1] / m_real - mean * mean, 0.0)
    g = jnp.pad(gamma.reshape(-1).astype(jnp.float32), (0, cp - gamma.size))
    b = jnp.pad(beta.reshape(-1).astype(jnp.float32), (0, cp - beta.size))
    scale = g * jax.lax.rsqrt(var + EPS)
    shift = b - mean * scale
    return scale.reshape(1, cp), shift.reshape(1, cp)


def init_resblock_params(key, in_ch, first3x3out, out_ch, downsample):
    ks = jax.random.split(key, 6)
    p = {
        # conv weights kept in HWIO order.
        "w1": 0.1 * jax.random.normal(ks[0], (3, 3, in_ch, first3x3out), jnp.float32),
        "g1": 1.0 + 0.1 * jax.random.normal(ks[1], (1, first3x3out), jnp.float32),
        "b1": 0.1 * jax.random.normal(ks[2], (1, first3x3out), jnp.float32),
        "w2": 0.1 * jax.random.normal(ks[3], (3, 3, first3x3out, out_ch), jnp.float32),
        "g2": 1.0 + 0.1 * jax.random.normal(ks[4], (1, out_ch), jnp.float32),
        "b2": 0.1 * jax.random.normal(ks[5], (1, out_ch), jnp.float32),
    }
    if downsample:
        kd = jax.random.split(ks[0], 3)
        p["wd"] = 0.1 * jax.random.normal(kd[0], (in_ch, out_ch), jnp.float32)
        p["gd"] = 1.0 + 0.1 * jax.random.normal(kd[1], (1, out_ch), jnp.float32)
        p["bd"] = 0.1 * jax.random.normal(kd[2], (1, out_ch), jnp.float32)
    return p


def resblock_forward(x_nchw, params, downsample):
    x = jnp.transpose(x_nchw, (0, 2, 3, 1)).astype(jnp.float32)   # NCHW -> NHWC
    x_bf = x.astype(jnp.bfloat16)
    n, h, w, cin = x.shape
    c1 = params["w1"].shape[-1]
    cout = params["w2"].shape[-1]
    c1p = _round_up(c1, LANE)
    coutp = _round_up(cout, LANE)
    stride1 = 2 if downsample else 1
    ho = (h + 2 - 3) // stride1 + 1
    wo = (w + 2 - 3) // stride1 + 1
    m = n * ho * wo

    # ---- conv1 ----
    if downsample:
        p1, _ = im2col_3x3(x_bf, 2)                      # (N, Ho*Wo, 9*Cin)
        kp = _round_up(9 * cin, LANE)
        p1 = jnp.pad(p1, ((0, 0), (0, 0), (0, kp - 9 * cin)))
        w1 = _pad2d(params["w1"].reshape(9 * cin, c1), kp, c1p).astype(jnp.bfloat16)
        z1, st1 = gemm_stats(p1, w1)
    else:
        xp = jnp.pad(x_bf, ((0, 0), (1, 1), (1, 1), (0, 0)))
        w1 = jnp.pad(params["w1"].reshape(9, cin, c1),
                     ((0, 0), (0, 0), (0, c1p - c1))).astype(jnp.bfloat16)
        z1, st1 = conv3x3s1_stats(xp, w1, ho, wo)
    sc1, sh1 = _bn_scale_shift(st1, m, params["g1"], params["b1"], c1p)

    # ---- bn1 + relu, emitted bf16 and spatially padded for conv2 ----
    y1p = bn_relu_pad(z1, sc1, sh1, ho, wo)              # (N, Ho+2, Wo+2, C1p)

    # ---- conv2 (stride-1 implicit GEMM) -> bn2 stats ----
    w2 = jnp.pad(params["w2"].reshape(9, c1, cout),
                 ((0, 0), (0, c1p - c1), (0, coutp - cout))).astype(jnp.bfloat16)
    z2, st2 = conv3x3s1_stats(y1p, w2, ho, wo)
    sc2, sh2 = _bn_scale_shift(st2, m, params["g2"], params["b2"], coutp)

    # ---- residual branch, add, relu ----
    if downsample:
        kdp = _round_up(cin, LANE)
        x_sub = x_bf[:, ::2, ::2, :].reshape(n, ho * wo, cin)      # 1x1 stride 2
        x_sub = jnp.pad(x_sub, ((0, 0), (0, 0), (0, kdp - cin)))
        wd = _pad2d(params["wd"], kdp, coutp).astype(jnp.bfloat16)
        zd, std = gemm_stats(x_sub, wd)
        scd, shd = _bn_scale_shift(std, m, params["gd"], params["bd"], coutp)
        out = _epilogue(bn_add_bn_relu_kernel, z2, sc2, sh2, zd, scd, shd)
    else:
        assert cin == cout, "identity residual requires in_ch == out_ch"
        r = x_bf.reshape(n, h * w, cin)                             # bf16 residual
        r = jnp.pad(r, ((0, 0), (0, 0), (0, coutp - cin)))
        out = _epilogue(bn_add_relu_kernel, z2, sc2, sh2, r)

    out = out[:, :, :cout].reshape(n, ho, wo, cout)
    return jnp.transpose(out, (0, 3, 1, 2))              # NHWC -> NCHW


# ---------------------------------------------------------------------------
# Pure-JAX reference (f32) for a sanity check.
# ---------------------------------------------------------------------------
def _ref_forward(x_nchw, params, downsample):
    def conv(xx, w_hwio, stride, pad):
        return jax.lax.conv_general_dilated(
            xx, w_hwio, (stride, stride), ((pad, pad), (pad, pad)),
            dimension_numbers=("NHWC", "HWIO", "NHWC"))

    def bn(z, g, b):
        mean = jnp.mean(z, axis=(0, 1, 2))
        var = jnp.mean(jnp.square(z - mean), axis=(0, 1, 2))
        return (z - mean) * jax.lax.rsqrt(var + EPS) * g.reshape(-1) + b.reshape(-1)

    xx = jnp.transpose(x_nchw, (0, 2, 3, 1)).astype(jnp.float32)
    s = 2 if downsample else 1
    y = jax.nn.relu(bn(conv(xx, params["w1"], s, 1), params["g1"], params["b1"]))
    y = bn(conv(y, params["w2"], 1, 1), params["g2"], params["b2"])
    if downsample:
        wd = params["wd"].reshape(1, 1, *params["wd"].shape)
        r = bn(conv(xx, wd, 2, 0), params["gd"], params["bd"])
    else:
        r = xx
    out = jax.nn.relu(y + r)
    return jnp.transpose(out, (0, 3, 1, 2))


if __name__ == "__main__":
    key = jax.random.PRNGKey(0)
    kx, kp1, kp2 = jax.random.split(key, 3)

    # Small shapes: batch=2, in_ch=4, spatial=16.
    x = jax.random.normal(kx, (2, 4, 16, 16), jnp.float32)

    # downsample=True block: 4 -> 8 -> 8 channels, spatial 16 -> 8.
    params_d = init_resblock_params(kp1, 4, 8, 8, downsample=True)
    fwd_d = jax.jit(functools.partial(resblock_forward, downsample=True))
    y_d = fwd_d(x, params_d)
    jax.block_until_ready(y_d)
    assert y_d.shape == (2, 8, 8, 8)
    err_d = float(jnp.max(jnp.abs(y_d - _ref_forward(x, params_d, True))))
    assert err_d < 0.25, f"downsample mismatch: {err_d}"

    # downsample=False block: 4 -> 8 -> 4 channels, spatial preserved.
    params_i = init_resblock_params(kp2, 4, 8, 4, downsample=False)
    fwd_i = jax.jit(functools.partial(resblock_forward, downsample=False))
    y_i = fwd_i(x, params_i)
    jax.block_until_ready(y_i)
    assert y_i.shape == (2, 4, 16, 16)
    err_i = float(jnp.max(jnp.abs(y_i - _ref_forward(x, params_i, False))))
    assert err_i < 0.25, f"identity mismatch: {err_i}"

    print("KERNEL_OK")
</pallas_src>

<mosaic_0001>
module attributes {stable_mosaic.version = 11 : i64} {
  func.func @gemm_stats_kernel(%arg0: i32, %arg1: memref<1x64x128xbf16, #tpu.memory_space<vmem>>, %arg2: memref<128x128xbf16, #tpu.memory_space<vmem>>, %arg3: memref<1x64x128xbf16, #tpu.memory_space<vmem>>, %arg4: memref<1x2x128xf32, #tpu.memory_space<vmem>>) attributes {dimension_semantics = [#tpu.dimension_semantics<parallel>], iteration_bounds = array<i64: 2>, scalar_prefetch = 0 : i64, scratch_operands = 0 : i64, tpu.core_type = #tpu.core_type<tc>, window_params = [{transform_indices = @transform_0, window_bounds = array<i64: 1, 64, 128>}, {pipeline_mode = #tpu.pipeline_mode<synchronous>, transform_indices = @transform_1, window_bounds = array<i64: 128, 128>}, {transform_indices = @transform_2, window_bounds = array<i64: 1, 64, 128>}, {transform_indices = @transform_3, window_bounds = array<i64: 1, 2, 128>}]} {
    %c0 = arith.constant 0 : index
    %c0_0 = arith.constant 0 : index
    %c0_1 = arith.constant 0 : index
    %0 = vector.load %arg1[%c0, %c0_0, %c0_1] : memref<1x64x128xbf16, #tpu.memory_space<vmem>>, vector<1x64x128xbf16>
    %1 = vector.shape_cast %0 : vector<1x64x128xbf16> to vector<64x128xbf16>
    %c0_2 = arith.constant 0 : index
    %c0_3 = arith.constant 0 : index
    %2 = vector.load %arg2[%c0_2, %c0_3] : memref<128x128xbf16, #tpu.memory_space<vmem>>, vector<128x128xbf16>
    %cst = arith.constant dense<0.000000e+00> : vector<64x128xf32>
    %3 = tpu.matmul %1, %2, %cst {dimension_numbers = #tpu.dot_dimension_numbers<[1], [0], [0], [1], [0, 0, 1, 1], [], []>} : vector<64x128xbf16>, vector<128x128xbf16>, vector<64x128xf32> -> vector<64x128xf32>
    %4 = arith.truncf %3 : vector<64x128xf32> to vector<64x128xbf16>
    %c0_4 = arith.constant 0 : index
    %c0_5 = arith.constant 0 : index
    %c0_6 = arith.constant 0 : index
    %5 = vector.load %arg3[%c0_4, %c0_5, %c0_6] : memref<1x64x128xbf16, #tpu.memory_space<vmem>>, vector<1x64x128xbf16>
    %6 = vector.shape_cast %5 : vector<1x64x128xbf16> to vector<64x128xbf16>
    %7 = vector.shape_cast %4 : vector<64x128xbf16> to vector<1x64x128xbf16>
    tpu.vector_store %arg3[%c0_4, %c0_5, %c0_6], %7 {strides = array<i32>} : memref<1x64x128xbf16, #tpu.memory_space<vmem>>, vector<1x64x128xbf16>,
    %cst_7 = arith.constant dense<0.000000e+00> : vector<128xf32>
    %8 = vector.multi_reduction <add>, %3, %cst_7 [0] : vector<64x128xf32> to vector<128xf32>
    %9 = vector.shape_cast %8 : vector<128xf32> to vector<1x128xf32>
    %10 = arith.mulf %3, %3 : vector<64x128xf32>
    %cst_8 = arith.constant dense<0.000000e+00> : vector<128xf32>
    %11 = vector.multi_reduction <add>, %10, %cst_8 [0] : vector<64x128xf32> to vector<128xf32>
    %12 = vector.shape_cast %11 : vector<128xf32> to vector<1x128xf32>
    %13 = tpu.concatenate %9, %12 in 0 : vector<1x128xf32>, vector<1x128xf32> -> vector<2x128xf32>
    %c0_9 = arith.constant 0 : index
    %c0_10 = arith.constant 0 : index
    %c0_11 = arith.constant 0 : index
    %14 = vector.load %arg4[%c0_9, %c0_10, %c0_11] : memref<1x2x128xf32, #tpu.memory_space<vmem>>, vector<1x2x128xf32>
    %15 = vector.shape_cast %14 : vector<1x2x128xf32> to vector<2x128xf32>
    %16 = vector.shape_cast %13 : vector<2x128xf32> to vector<1x2x128xf32>
    tpu.vector_store %arg4[%c0_9, %c0_10, %c0_11], %16 {strides = array<i32>} : memref<1x2x128xf32, #tpu.memory_space<vmem>>, vector<1x2x128xf32>,
    return
  }
  func.func @transform_0(%arg0: i32) -> (i32, i32, i32) {
    %c0_i32 = arith.constant 0 : i32
    %c0_i32_0 = arith.constant 0 : i32
    %c0_i32_1 = arith.constant 0 : i32
    return %arg0, %c0_i32, %c0_i32_0 : i32, i32, i32
  }
  func.func @transform_1(%arg0: i32) -> (i32, i32) {
    %c0_i32 = arith.constant 0 : i32
    %c0_i32_0 = arith.constant 0 : i32
    %c0_i32_1 = arith.constant 0 : i32
    return %c0_i32, %c0_i32_0 : i32, i32
  }
  func.func @transform_2(%arg0: i32) -> (i32, i32, i32) {
    %c0_i32 = arith.constant 0 : i32
    %c0_i32_0 = arith.constant 0 : i32
    %c0_i32_1 = arith.constant 0 : i32
    return %arg0, %c0_i32, %c0_i32_0 : i32, i32, i32
  }
  func.func @transform_3(%arg0: i32) -> (i32, i32, i32) {
    %c0_i32 = arith.constant 0 : i32
    %c0_i32_0 = arith.constant 0 : i32
    %c0_i32_1 = arith.constant 0 : i32
    return %arg0, %c0_i32, %c0_i32_0 : i32, i32, i32
  }
}

module attributes {stable_mosaic.version = 11 : i64} {
  func.func @bn_relu_pad_kernel(%arg0: i32, %arg1: memref<1x64x128xbf16, #tpu.memory_space<vmem>>, %arg2: memref<1x128xf32, #tpu.memory_space<vmem>>, %arg3: memref<1x128xf32, #tpu.memory_space<vmem>>, %arg4: memref<1x10x10x128xbf16, #tpu.memory_space<vmem>>) attributes {dimension_semantics = [#tpu.dimension_semantics<parallel>], iteration_bounds = array<i64: 2>, scalar_prefetch = 0 : i64, scratch_operands = 0 : i64, tpu.core_type = #tpu.core_type<tc>, window_params = [{transform_indices = @transform_0, window_bounds = array<i64: 1, 64, 128>}, {pipeline_mode = #tpu.pipeline_mode<synchronous>, transform_indices = @transform_1, window_bounds = array<i64: 1, 128>}, {pipeline_mode = #tpu.pipeline_mode<synchronous>, transform_indices = @transform_2, window_bounds = array<i64: 1, 128>}, {transform_indices = @transform_3, window_bounds = array<i64: 1, 10, 10, 128>}]} {
    %c0 = arith.constant 0 : index
    %c0_0 = arith.constant 0 : index
    %c0_1 = arith.constant 0 : index
    %0 = vector.load %arg1[%c0, %c0_0, %c0_1] : memref<1x64x128xbf16, #tpu.memory_space<vmem>>, vector<1x64x128xbf16>
    %1 = vector.shape_cast %0 : vector<1x64x128xbf16> to vector<64x128xbf16>
    %2 = arith.extf %1 : vector<64x128xbf16> to vector<64x128xf32>
    %c0_2 = arith.constant 0 : index
    %c0_3 = arith.constant 0 : index
    %3 = vector.load %arg2[%c0_2, %c0_3] : memref<1x128xf32, #tpu.memory_space<vmem>>, vector<1x128xf32>
    %4 = vector.broadcast %3 : vector<1x128xf32> to vector<64x128xf32>
    %5 = arith.mulf %2, %4 : vector<64x128xf32>
    %c0_4 = arith.constant 0 : index
    %c0_5 = arith.constant 0 : index
    %6 = vector.load %arg3[%c0_4, %c0_5] : memref<1x128xf32, #tpu.memory_space<vmem>>, vector<1x128xf32>
    %7 = vector.broadcast %6 : vector<1x128xf32> to vector<64x128xf32>
    %8 = arith.addf %5, %7 : vector<64x128xf32>
    %cst = arith.constant 0.000000e+00 : f32
    %9 = vector.broadcast %cst : f32 to vector<64x128xf32>
    %10 = arith.maximumf %8, %9 : vector<64x128xf32>
    %11 = vector.shape_cast %10 : vector<64x128xf32> to vector<8x8x128xf32>
    %12 = arith.truncf %11 : vector<8x8x128xf32> to vector<8x8x128xbf16>
    %cst_6 = arith.constant 0.000000e+00 : bf16
    %13 = vector.broadcast %cst_6 : bf16 to vector<8x1x128xbf16>
    %cst_7 = arith.constant 0.000000e+00 : bf16
    %14 = vector.broadcast %cst_7 : bf16 to vector<1x10x128xbf16>
    %15 = tpu.concatenate %13, %12, %13 in 1 : vector<8x1x128xbf16>, vector<8x8x128xbf16>, vector<8x1x128xbf16> -> vector<8x10x128xbf16>
    %16 = tpu.concatenate %14, %15, %14 in 0 : vector<1x10x128xbf16>, vector<8x10x128xbf16>, vector<1x10x128xbf16> -> vector<10x10x128xbf16>
    %c0_8 = arith.constant 0 : index
    %c0_9 = arith.constant 0 : index
    %c0_10 = arith.constant 0 : index
    %c0_11 = arith.constant 0 : index
    %17 = vector.load %arg4[%c0_8, %c0_9, %c0_10, %c0_11] : memref<1x10x10x128xbf16, #tpu.memory_space<vmem>>, vector<1x10x10x128xbf16>
    %18 = vector.shape_cast %17 : vector<1x10x10x128xbf16> to vector<10x10x128xbf16>
    %19 = vector.shape_cast %16 : vector<10x10x128xbf16> to vector<1x10x10x128xbf16>
    tpu.vector_store %arg4[%c0_8, %c0_9, %c0_10, %c0_11], %19 {strides = array<i32>} : memref<1x10x10x128xbf16, #tpu.memory_space<vmem>>, vector<1x10x10x128xbf16>,
    return
  }
  func.func @transform_0(%arg0: i32) -> (i32, i32, i32) {
    %c0_i32 = arith.constant 0 : i32
    %c0_i32_0 = arith.constant 0 : i32
    %c0_i32_1 = arith.constant 0 : i32
    return %arg0, %c0_i32, %c0_i32_0 : i32, i32, i32
  }
  func.func @transform_1(%arg0: i32) -> (i32, i32) {
    %c0_i32 = arith.constant 0 : i32
    %c0_i32_0 = arith.constant 0 : i32
    %c0_i32_1 = arith.constant 0 : i32
    return %c0_i32, %c0_i32_0 : i32, i32
  }
  func.func @transform_2(%arg0: i32) -> (i32, i32) {
    %c0_i32 = arith.constant 0 : i32
    %c0_i32_0 = arith.constant 0 : i32
    %c0_i32_1 = arith.constant 0 : i32
    return %c0_i32, %c0_i32_0 : i32, i32
  }
  func.func @transform_3(%arg0: i32) -> (i32, i32, i32, i32) {
    %c0_i32 = arith.constant 0 : i32
    %c0_i32_0 = arith.constant 0 : i32
    %c0_i32_1 = arith.constant 0 : i32
    %c0_i32_2 = arith.constant 0 : i32
    return %arg0, %c0_i32, %c0_i32_0, %c0_i32_1 : i32, i32, i32, i32
  }
}

module attributes {stable_mosaic.version = 11 : i64} {
  func.func @conv3x3s1_stats_kernel(%arg0: i32, %arg1: memref<1x10x10x128xbf16, #tpu.memory_space<vmem>>, %arg2: memref<9x128x128xbf16, #tpu.memory_space<vmem>>, %arg3: memref<1x64x128xbf16, #tpu.memory_space<vmem>>, %arg4: memref<1x2x128xf32, #tpu.memory_space<vmem>>) attributes {dimension_semantics = [#tpu.dimension_semantics<parallel>], iteration_bounds = array<i64: 2>, scalar_prefetch = 0 : i64, scratch_operands = 0 : i64, tpu.core_type = #tpu.core_type<tc>, window_params = [{transform_indices = @transform_0, window_bounds = array<i64: 1, 10, 10, 128>}, {pipeline_mode = #tpu.pipeline_mode<synchronous>, transform_indices = @transform_1, window_bounds = array<i64: 9, 128, 128>}, {transform_indices = @transform_2, window_bounds = array<i64: 1, 64, 128>}, {transform_indices = @transform_3, window_bounds = array<i64: 1, 2, 128>}]} {
    %c0 = arith.constant 0 : index
    %c0_0 = arith.constant 0 : index
    %c0_1 = arith.constant 0 : index
    %c0_2 = arith.constant 0 : index
    %0 = vector.load %arg1[%c0, %c0_0, %c0_1, %c0_2] : memref<1x10x10x128xbf16, #tpu.memory_space<vmem>>, vector<1x8x8x128xbf16>
    %1 = vector.shape_cast %0 : vector<1x8x8x128xbf16> to vector<8x8x128xbf16>
    %2 = vector.shape_cast %1 : vector<8x8x128xbf16> to vector<64x128xbf16>
    %c0_3 = arith.constant 0 : index
    %c0_4 = arith.constant 0 : index
    %c0_5 = arith.constant 0 : index
    %3 = vector.load %arg2[%c0_3, %c0_4, %c0_5] : memref<9x128x128xbf16, #tpu.memory_space<vmem>>, vector<1x128x128xbf16>
    %4 = vector.shape_cast %3 : vector<1x128x128xbf16> to vector<128x128xbf16>
    %cst = arith.constant dense<0.000000e+00> : vector<64x128xf32>
    %5 = tpu.matmul %2, %4, %cst {dimension_numbers = #tpu.dot_dimension_numbers<[1], [0], [0], [1], [0, 0, 1, 1], [], []>} : vector<64x128xbf16>, vector<128x128xbf16>, vector<64x128xf32> -> vector<64x128xf32>
    %c0_6 = arith.constant 0 : index
    %c0_7 = arith.constant 0 : index
    %c1 = arith.constant 1 : index
    %c0_8 = arith.constant 0 : index
    %6 = vector.load %arg1[%c0_6, %c0_7, %c1, %c0_8] : memref<1x10x10x128xbf16, #tpu.memory_space<vmem>>, vector<1x8x8x128xbf16>
    %7 = vector.shape_cast %6 : vector<1x8x8x128xbf16> to vector<8x8x128xbf16>
    %8 = vector.shape_cast %7 : vector<8x8x128xbf16> to vector<64x128xbf16>
    %c1_9 = arith.constant 1 : index
    %c0_10 = arith.constant 0 : index
    %c0_11 = arith.constant 0 : index
    %9 = vector.load %arg2[%c1_9, %c0_10, %c0_11] : memref<9x128x128xbf16, #tpu.memory_space<vmem>>, vector<1x128x128xbf16>
    %10 = vector.shape_cast %9 : vector<1x128x128xbf16> to vector<128x128xbf16>
    %cst_12 = arith.constant dense<0.000000e+00> : vector<64x128xf32>
    %11 = tpu.matmul %8, %10, %cst_12 {dimension_numbers = #tpu.dot_dimension_numbers<[1], [0], [0], [1], [0, 0, 1, 1], [], []>} : vector<64x128xbf16>, vector<128x128xbf16>, vector<64x128xf32> -> vector<64x128xf32>
    %12 = arith.addf %5, %11 : vector<64x128xf32>
    %c0_13 = arith.constant 0 : index
    %c0_14 = arith.constant 0 : index
    %c2 = arith.constant 2 : index
    %c0_15 = arith.constant 0 : index
    %13 = vector.load %arg1[%c0_13, %c0_14, %c2, %c0_15] : memref<1x10x10x128xbf16, #tpu.memory_space<vmem>>, vector<1x8x8x128xbf16>
    %14 = vector.shape_cast %13 : vector<1x8x8x128xbf16> to vector<8x8x128xbf16>
    %15 = vector.shape_cast %14 : vector<8x8x128xbf16> to vector<64x128xbf16>
    %c2_16 = arith.constant 2 : index
    %c0_17 = arith.constant 0 : index
    %c0_18 = arith.constant 0 : index
    %16 = vector.load %arg2[%c2_16, %c0_17, %c0_18] : memref<9x128x128xbf16, #tpu.memory_space<vmem>>, vector<1x128x128xbf16>
    %17 = vector.shape_cast %16 : vector<1x128x128xbf16> to vector<128x128xbf16>
    %cst_19 = arith.constant dense<0.000000e+00> : vector<64x128xf32>
    %18 = tpu.matmul %15, %17, %cst_19 {dimension_numbers = #tpu.dot_dimension_numbers<[1], [0], [0], [1], [0, 0, 1, 1], [], []>} : vector<64x128xbf16>, vector<128x128xbf16>, vector<64x128xf32> -> vector<64x128xf32>
    %19 = arith.addf %12, %18 : vector<64x128xf32>
    %c0_20 = arith.constant 0 : index
    %c1_21 = arith.constant 1 : index
    %c0_22 = arith.constant 0 : index
    %c0_23 = arith.constant 0 : index
    %20 = vector.load %arg1[%c0_20, %c1_21, %c0_22, %c0_23] : memref<1x10x10x128xbf16, #tpu.memory_space<vmem>>, vector<1x8x8x128xbf16>
    %21 = vector.shape_cast %20 : vector<1x8x8x128xbf16> to vector<8x8x128xbf16>
    %22 = vector.shape_cast %21 : vector<8x8x128xbf16> to vector<64x128xbf16>
    %c3 = arith.constant 3 : index
    %c0_24 = arith.constant 0 : index
    %c0_25 = arith.constant 0 : index
    %23 = vector.load %arg2[%c3, %c0_24, %c0_25] : memref<9x128x128xbf16, #tpu.memory_space<vmem>>, vector<1x128x128xbf16>
    %24 = vector.shape_cast %23 : vector<1x128x128xbf16> to vector<128x128xbf16>
    %cst_26 = arith.constant dense<0.000000e+00> : vector<64x128xf32>
    %25 = tpu.matmul %22, %24, %cst_26 {dimension_numbers = #tpu.dot_dimension_numbers<[1], [0], [0], [1], [0, 0, 1, 1], [], []>} : vector<64x128xbf16>, vector<128x128xbf16>, vector<64x128xf32> -> vector<64x128xf32>
    %26 = arith.addf %19, %25 : vector<64x128xf32>
    %c0_27 = arith.constant 0 : index
    %c1_28 = arith.constant 1 : index
    %c1_29 = arith.constant 1 : index
    %c0_30 = arith.constant 0 : index
    %27 = vector.load %arg1[%c0_27, %c1_28, %c1_29, %c0_30] : memref<1x10x10x128xbf16, #tpu.memory_space<vmem>>, vector<1x8x8x128xbf16>
    %28 = vector.shape_cast %27 : vector<1x8x8x128xbf16> to vector<8x8x128xbf16>
    %29 = vector.shape_cast %28 : vector<8x8x128xbf16> to vector<64x128xbf16>
    %c4 = arith.constant 4 : index
    %c0_31 = arith.constant 0 : index
    %c0_32 = arith.constant 0 : index
    %30 = vector.load %arg2[%c4, %c0_31, %c0_32] : memref<9x128x128xbf16, #tpu.memory_space<vmem>>, vector<1x128x128xbf16>
    %31 = vector.shape_cast %30 : vector<1x128x128xbf16> to vector<128x128xbf16>
    %cst_33 = arith.constant dense<0.000000e+00> : vector<64x128xf32>
    %32 = tpu.matmul %29, %31, %cst_33 {dimension_numbers = #tpu.dot_dimension_numbers<[1], [0], [0], [1], [0, 0, 1, 1], [], []>} : vector<64x128xbf16>, vector<128x128xbf16>, vector<64x128xf32> -> vector<64x128xf32>
    %33 = arith.addf %26, %32 : vector<64x128xf32>
    %c0_34 = arith.constant 0 : index
    %c1_35 = arith.constant 1 : index
    %c2_36 = arith.constant 2 : index
    %c0_37 = arith.constant 0 : index
    %34 = vector.load %arg1[%c0_34, %c1_35, %c2_36, %c0_37] : memref<1x10x10x128xbf16, #tpu.memory_space<vmem>>, vector<1x8x8x128xbf16>
    %35 = vector.shape_cast %34 : vector<1x8x8x128xbf16> to vector<8x8x128xbf16>
    %36 = vector.shape_cast %35 : vector<8x8x128xbf16> to vector<64x128xbf16>
    %c5 = arith.constant 5 : index
    %c0_38 = arith.constant 0 : index
    %c0_39 = arith.constant 0 : index
    %37 = vector.load %arg2[%c5, %c0_38, %c0_39] : memref<9x128x128xbf16, #tpu.memory_space<vmem>>, vector<1x128x128xbf16>
    %38 = vector.shape_cast %37 : vector<1x128x128xbf16> to vector<128x128xbf16>
    %cst_40 = arith.constant dense<0.000000e+00> : vector<64x128xf32>
    %39 = tpu.matmul %36, %38, %cst_40 {dimension_numbers = #tpu.dot_dimension_numbers<[1], [0], [0], [1], [0, 0, 1, 1], [], []>} : vector<64x128xbf16>, vector<128x128xbf16>, vector<64x128xf32> -> vector<64x128xf32>
    %40 = arith.addf %33, %39 : vector<64x128xf32>
    %c0_41 = arith.constant 0 : index
    %c2_42 = arith.constant 2 : index
    %c0_43 = arith.constant 0 : index
    %c0_44 = arith.constant 0 : index
    %41 = vector.load %arg1[%c0_41, %c2_42, %c0_43, %c0_44] : memref<1x10x10x128xbf16, #tpu.memory_space<vmem>>, vector<1x8x8x128xbf16>
    %42 = vector.shape_cast %41 : vector<1x8x8x128xbf16> to vector<8x8x128xbf16>
    %43 = vector.shape_cast %42 : vector<8x8x128xbf16> to vector<64x128xbf16>
    %c6 = arith.constant 6 : index
    %c0_45 = arith.constant 0 : index
    %c0_46 = arith.constant 0 : index
    %44 = vector.load %arg2[%c6, %c0_45, %c0_46] : memref<9x128x128xbf16, #tpu.memory_space<vmem>>, vector<1x128x128xbf16>
    %45 = vector.shape_cast %44 : vector<1x128x128xbf16> to vector<128x128xbf16>
    %cst_47 = arith.constant dense<0.000000e+00> : vector<64x128xf32>
    %46 = tpu.matmul %43, %45, %cst_47 {dimension_numbers = #tpu.dot_dimension_numbers<[1], [0], [0], [1], [0, 0, 1, 1], [], []>} : vector<64x128xbf16>, vector<128x128xbf16>, vector<64x128xf32> -> vector<64x128xf32>
    %47 = arith.addf %40, %46 : vector<64x128xf32>
    %c0_48 = arith.constant 0 : index
    %c2_49 = arith.constant 2 : index
    %c1_50 = arith.constant 1 : index
    %c0_51 = arith.constant 0 : index
    %48 = vector.load %arg1[%c0_48, %c2_49, %c1_50, %c0_51] : memref<1x10x10x128xbf16, #tpu.memory_space<vmem>>, vector<1x8x8x128xbf16>
    %49 = vector.shape_cast %48 : vector<1x8x8x128xbf16> to vector<8x8x128xbf16>
    %50 = vector.shape_cast %49 : vector<8x8x128xbf16> to vector<64x128xbf16>
    %c7 = arith.constant 7 : index
    %c0_52 = arith.constant 0 : index
    %c0_53 = arith.constant 0 : index
    %51 = vector.load %arg2[%c7, %c0_52, %c0_53] : memref<9x128x128xbf16, #tpu.memory_space<vmem>>, vector<1x128x128xbf16>
    %52 = vector.shape_cast %51 : vector<1x128x128xbf16> to vector<128x128xbf16>
    %cst_54 = arith.constant dense<0.000000e+00> : vector<64x128xf32>
    %53 = tpu.matmul %50, %52, %cst_54 {dimension_numbers = #tpu.dot_dimension_numbers<[1], [0], [0], [1], [0, 0, 1, 1], [], []>} : vector<64x128xbf16>, vector<128x128xbf16>, vector<64x128xf32> -> vector<64x128xf32>
    %54 = arith.addf %47, %53 : vector<64x128xf32>
    %c0_55 = arith.constant 0 : index
    %c2_56 = arith.constant 2 : index
    %c2_57 = arith.constant 2 : index
    %c0_58 = arith.constant 0 : index
    %55 = vector.load %arg1[%c0_55, %c2_56, %c2_57, %c0_58] : memref<1x10x10x128xbf16, #tpu.memory_space<vmem>>, vector<1x8x8x128xbf16>
    %56 = vector.shape_cast %55 : vector<1x8x8x128xbf16> to vector<8x8x128xbf16>
    %57 = vector.shape_cast %56 : vector<8x8x128xbf16> to vector<64x128xbf16>
    %c8 = arith.constant 8 : index
    %c0_59 = arith.constant 0 : index
    %c0_60 = arith.constant 0 : index
    %58 = vector.load %arg2[%c8, %c0_59, %c0_60] : memref<9x128x128xbf16, #tpu.memory_space<vmem>>, vector<1x128x128xbf16>
    %59 = vector.shape_cast %58 : vector<1x128x128xbf16> to vector<128x128xbf16>
    %cst_61 = arith.constant dense<0.000000e+00> : vector<64x128xf32>
    %60 = tpu.matmul %57, %59, %cst_61 {dimension_numbers = #tpu.dot_dimension_numbers<[1], [0], [0], [1], [0, 0, 1, 1], [], []>} : vector<64x128xbf16>, vector<128x128xbf16>, vector<64x128xf32> -> vector<64x128xf32>
    %61 = arith.addf %54, %60 : vector<64x128xf32>
    %62 = arith.truncf %61 : vector<64x128xf32> to vector<64x128xbf16>
    %c0_62 = arith.constant 0 : index
    %c0_63 = arith.constant 0 : index
    %c0_64 = arith.constant 0 : index
    %63 = vector.load %arg3[%c0_62, %c0_63, %c0_64] : memref<1x64x128xbf16, #tpu.memory_space<vmem>>, vector<1x64x128xbf16>
    %64 = vector.shape_cast %63 : vector<1x64x128xbf16> to vector<64x128xbf16>
    %65 = vector.shape_cast %62 : vector<64x128xbf16> to vector<1x64x128xbf16>
    tpu.vector_store %arg3[%c0_62, %c0_63, %c0_64], %65 {strides = array<i32>} : memref<1x64x128xbf16, #tpu.memory_space<vmem>>, vector<1x64x128xbf16>,
    %cst_65 = arith.constant dense<0.000000e+00> : vector<128xf32>
    %66 = vector.multi_reduction <add>, %61, %cst_65 [0] : vector<64x128xf32> to vector<128xf32>
    %67 = vector.shape_cast %66 : vector<128xf32> to vector<1x128xf32>
    %68 = arith.mulf %61, %61 : vector<64x128xf32>
    %cst_66 = arith.constant dense<0.000000e+00> : vector<128xf32>
    %69 = vector.multi_reduction <add>, %68, %cst_66 [0] : vector<64x128xf32> to vector<128xf32>
    %70 = vector.shape_cast %69 : vector<128xf32> to vector<1x128xf32>
    %71 = tpu.concatenate %67, %70 in 0 : vector<1x128xf32>, vector<1x128xf32> -> vector<2x128xf32>
    %c0_67 = arith.constant 0 : index
    %c0_68 = arith.constant 0 : index
    %c0_69 = arith.constant 0 : index
    %72 = vector.load %arg4[%c0_67, %c0_68, %c0_69] : memref<1x2x128xf32, #tpu.memory_space<vmem>>, vector<1x2x128xf32>
    %73 = vector.shape_cast %72 : vector<1x2x128xf32> to vector<2x128xf32>
    %74 = vector.shape_cast %71 : vector<2x128xf32> to vector<1x2x128xf32>
    tpu.vector_store %arg4[%c0_67, %c0_68, %c0_69], %74 {strides = array<i32>} : memref<1x2x128xf32, #tpu.memory_space<vmem>>, vector<1x2x128xf32>,
    return
  }
  func.func @transform_0(%arg0: i32) -> (i32, i32, i32, i32) {
    %c0_i32 = arith.constant 0 : i32
    %c0_i32_0 = arith.constant 0 : i32
    %c0_i32_1 = arith.constant 0 : i32
    %c0_i32_2 = arith.constant 0 : i32
    return %arg0, %c0_i32, %c0_i32_0, %c0_i32_1 : i32, i32, i32, i32
  }
  func.func @transform_1(%arg0: i32) -> (i32, i32, i32) {
    %c0_i32 = arith.constant 0 : i32
    %c0_i32_0 = arith.constant 0 : i32
    %c0_i32_1 = arith.constant 0 : i32
    %c0_i32_2 = arith.constant 0 : i32
    return %c0_i32, %c0_i32_0, %c0_i32_1 : i32, i32, i32
  }
  func.func @transform_2(%arg0: i32) -> (i32, i32, i32) {
    %c0_i32 = arith.constant 0 : i32
    %c0_i32_0 = arith.constant 0 : i32
    %c0_i32_1 = arith.constant 0 : i32
    return %arg0, %c0_i32, %c0_i32_0 : i32, i32, i32
  }
  func.func @transform_3(%arg0: i32) -> (i32, i32, i32) {
    %c0_i32 = arith.constant 0 : i32
    %c0_i32_0 = arith.constant 0 : i32
    %c0_i32_1 = arith.constant 0 : i32
    return %arg0, %c0_i32, %c0_i32_0 : i32, i32, i32
  }
}

module attributes {stable_mosaic.version = 11 : i64} {
  func.func @bn_add_bn_relu_kernel(%arg0: i32, %arg1: memref<1x64x128xbf16, #tpu.memory_space<vmem>>, %arg2: memref<1x128xf32, #tpu.memory_space<vmem>>, %arg3: memref<1x128xf32, #tpu.memory_space<vmem>>, %arg4: memref<1x64x128xbf16, #tpu.memory_space<vmem>>, %arg5: memref<1x128xf32, #tpu.memory_space<vmem>>, %arg6: memref<1x128xf32, #tpu.memory_space<vmem>>, %arg7: memref<1x64x128xf32, #tpu.memory_space<vmem>>) attributes {dimension_semantics = [#tpu.dimension_semantics<parallel>], iteration_bounds = array<i64: 2>, scalar_prefetch = 0 : i64, scratch_operands = 0 : i64, tpu.core_type = #tpu.core_type<tc>, window_params = [{transform_indices = @transform_0, window_bounds = array<i64: 1, 64, 128>}, {pipeline_mode = #tpu.pipeline_mode<synchronous>, transform_indices = @transform_1, window_bounds = array<i64: 1, 128>}, {pipeline_mode = #tpu.pipeline_mode<synchronous>, transform_indices = @transform_2, window_bounds = array<i64: 1, 128>}, {transform_indices = @transform_3, window_bounds = array<i64: 1, 64, 128>}, {pipeline_mode = #tpu.pipeline_mode<synchronous>, transform_indices = @transform_4, window_bounds = array<i64: 1, 128>}, {pipeline_mode = #tpu.pipeline_mode<synchronous>, transform_indices = @transform_5, window_bounds = array<i64: 1, 128>}, {transform_indices = @transform_6, window_bounds = array<i64: 1, 64, 128>}]} {
    %c0 = arith.constant 0 : index
    %c0_0 = arith.constant 0 : index
    %c0_1 = arith.constant 0 : index
    %0 = vector.load %arg1[%c0, %c0_0, %c0_1] : memref<1x64x128xbf16, #tpu.memory_space<vmem>>, vector<1x64x128xbf16>
    %1 = vector.shape_cast %0 : vector<1x64x128xbf16> to vector<64x128xbf16>
    %2 = arith.extf %1 : vector<64x128xbf16> to vector<64x128xf32>
    %c0_2 = arith.constant 0 : index
    %c0_3 = arith.constant 0 : index
    %3 = vector.load %arg2[%c0_2, %c0_3] : memref<1x128xf32, #tpu.memory_space<vmem>>, vector<1x128xf32>
    %4 = vector.broadcast %3 : vector<1x128xf32> to vector<64x128xf32>
    %5 = arith.mulf %2, %4 : vector<64x128xf32>
    %c0_4 = arith.constant 0 : index
    %c0_5 = arith.constant 0 : index
    %6 = vector.load %arg3[%c0_4, %c0_5] : memref<1x128xf32, #tpu.memory_space<vmem>>, vector<1x128xf32>
    %7 = vector.broadcast %6 : vector<1x128xf32> to vector<64x128xf32>
    %8 = arith.addf %5, %7 : vector<64x128xf32>
    %c0_6 = arith.constant 0 : index
    %c0_7 = arith.constant 0 : index
    %c0_8 = arith.constant 0 : index
    %9 = vector.load %arg4[%c0_6, %c0_7, %c0_8] : memref<1x64x128xbf16, #tpu.memory_space<vmem>>, vector<1x64x128xbf16>
    %10 = vector.shape_cast %9 : vector<1x64x128xbf16> to vector<64x128xbf16>
    %11 = arith.extf %10 : vector<64x128xbf16> to vector<64x128xf32>
    %c0_9 = arith.constant 0 : index
    %c0_10 = arith.constant 0 : index
    %12 = vector.load %arg5[%c0_9, %c0_10] : memref<1x128xf32, #tpu.memory_space<vmem>>, vector<1x128xf32>
    %13 = vector.broadcast %12 : vector<1x128xf32> to vector<64x128xf32>
    %14 = arith.mulf %11, %13 : vector<64x128xf32>
    %15 = arith.addf %8, %14 : vector<64x128xf32>
    %c0_11 = arith.constant 0 : index
    %c0_12 = arith.constant 0 : index
    %16 = vector.load %arg6[%c0_11, %c0_12] : memref<1x128xf32, #tpu.memory_space<vmem>>, vector<1x128xf32>
    %17 = vector.broadcast %16 : vector<1x128xf32> to vector<64x128xf32>
    %18 = arith.addf %15, %17 : vector<64x128xf32>
    %cst = arith.constant 0.000000e+00 : f32
    %19 = vector.broadcast %cst : f32 to vector<64x128xf32>
    %20 = arith.maximumf %18, %19 : vector<64x128xf32>
    %c0_13 = arith.constant 0 : index
    %c0_14 = arith.constant 0 : index
    %c0_15 = arith.constant 0 : index
    %21 = vector.load %arg7[%c0_13, %c0_14, %c0_15] : memref<1x64x128xf32, #tpu.memory_space<vmem>>, vector<1x64x128xf32>
    %22 = vector.shape_cast %21 : vector<1x64x128xf32> to vector<64x128xf32>
    %23 = vector.shape_cast %20 : vector<64x128xf32> to vector<1x64x128xf32>
    tpu.vector_store %arg7[%c0_13, %c0_14, %c0_15], %23 {strides = array<i32>} : memref<1x64x128xf32, #tpu.memory_space<vmem>>, vector<1x64x128xf32>,
    return
  }
  func.func @transform_0(%arg0: i32) -> (i32, i32, i32) {
    %c0_i32 = arith.constant 0 : i32
    %c0_i32_0 = arith.constant 0 : i32
    %c0_i32_1 = arith.constant 0 : i32
    return %arg0, %c0_i32, %c0_i32_0 : i32, i32, i32
  }
  func.func @transform_1(%arg0: i32) -> (i32, i32) {
    %c0_i32 = arith.constant 0 : i32
    %c0_i32_0 = arith.constant 0 : i32
    %c0_i32_1 = arith.constant 0 : i32
    return %c0_i32, %c0_i32_0 : i32, i32
  }
  func.func @transform_2(%arg0: i32) -> (i32, i32) {
    %c0_i32 = arith.constant 0 : i32
    %c0_i32_0 = arith.constant 0 : i32
    %c0_i32_1 = arith.constant 0 : i32
    return %c0_i32, %c0_i32_0 : i32, i32
  }
  func.func @transform_3(%arg0: i32) -> (i32, i32, i32) {
    %c0_i32 = arith.constant 0 : i32
    %c0_i32_0 = arith.constant 0 : i32
    %c0_i32_1 = arith.constant 0 : i32
    return %arg0, %c0_i32, %c0_i32_0 : i32, i32, i32
  }
  func.func @transform_4(%arg0: i32) -> (i32, i32) {
    %c0_i32 = arith.constant 0 : i32
    %c0_i32_0 = arith.constant 0 : i32
    %c0_i32_1 = arith.constant 0 : i32
    return %c0_i32, %c0_i32_0 : i32, i32
  }
  func.func @transform_5(%arg0: i32) -> (i32, i32) {
    %c0_i32 = arith.constant 0 : i32
    %c0_i32_0 = arith.constant 0 : i32
    %c0_i32_1 = arith.constant 0 : i32
    return %c0_i32, %c0_i32_0 : i32, i32
  }
  func.func @transform_6(%arg0: i32) -> (i32, i32, i32) {
    %c0_i32 = arith.constant 0 : i32
    %c0_i32_0 = arith.constant 0 : i32
    %c0_i32_1 = arith.constant 0 : i32
    return %arg0, %c0_i32, %c0_i32_0 : i32, i32, i32
  }
}

</mosaic_0001>

<bundles_post_ra>
// kernel: resblock_forward.5
= control target key start
LH: loop header
LB: loop body
LE: loop exit
PB: predicated region body
PF: predicated region fallthrough
CT: control target
= control target key end

     0   :  { %s603_s12 = smov 0   ;;  %s655_s0 = inlined_call_operand.vmem [shape: bf16[2,64,128], index: 0, kind: input, shape index: {}]   ;;  %s656_s1 = inlined_call_operand.vmem [shape: bf16[128,128], index: 1, kind: input, shape index: {}]   ;;  %s657_s2 = inlined_call_operand.vmem [shape: bf16[2,64,128], index: 2, kind: output, shape index: {0}]   ;;  %s658_s3 = inlined_call_operand.vmem [shape: f32[2,2,128], index: 3, kind: output, shape index: {1}]  }
   0x1 LB: > { %s446_s13 = sadd.s32 4294967295, %s581_s12   ;;  %p450_p0 = scmp.ge.s32.totalorder %s581_s12, 1  ;;  %s581_s12 = sphi %s603_s12, %s14_s12  }
   0x2   : > { %p140_p1 = scmp.lt.s32.totalorder %s581_s12, 3 }
   0x4   : > { %p141_p2 = pnand %p450_p0, %p140_p1 }
   0x5   : > { %p168_p3 = scmp.lt.s32.totalorder (!%p141_p2), %s446_s13, 1 }
   0x6   : > { %144 = sbr.rel (%p141_p2) target bundleno = 207 (0xcf), region = 28 }
   0xb   : > { %v519_v0 = vld [vmem:[%s656_s1 + $0x38] sm:$0xff]  ;;  %v518_v1 = vld [vmem:[%s656_s1 + $0x30] sm:$0xff]  ;;  %v517_v2 = vld [vmem:[%s656_s1 + $0x28] sm:$0xff]  ;;  %s660_s13 = smov (!%p168_p3, %s446_s13), 1  ;;  %vm357_vm0 = vcmask 1040384  }
   0xc   : > { %278 = vmatpush.bf16.msra.mxu0 %v519_v0  ;;  %543 = vmatpush.bf16.msra.mxu1 %v519_v0  ;;  %v516_v3 = vld [vmem:[%s656_s1 + $0x20] sm:$0xff]  ;;  %v515_v4 = vld [vmem:[%s656_s1 + $0x18] sm:$0xff]  ;;  %v514_v5 = vld [vmem:[%s656_s1 + $0x10] sm:$0xff]  ;;  %s506_s28 = sshll.u32 %s660_s13, 5  ;;  %s455_s10 = sshll.u32 %s660_s13, 1 }
   0xd   : > { %544 = vmatpush.bf16.msra.mxu2 %v519_v0  ;;  %545 = vmatpush.bf16.msra.mxu3 %v519_v0  ;;  %v513_v6 = vld [vmem:[%s656_s1 + $0x8] sm:$0xff]  ;;  %v512_v7 = vld [vmem:[%s656_s1] sm:$0xff]  ;;  %s172_s6 = scalar_lea.vmem %s655_s0, %s506_s28  ;;  %s177_s9 = scalar_lea.vmem %s657_s2, %s506_s28 }
   0xe   : > { %v508_v8 = vld [vmem:[%s172_s6] sm:$0xff]  ;;  %v509_v9 = vld [vmem:[%s172_s6 + $0x8] sm:$0xff]  ;;  %v510_v10 = vld [vmem:[%s172_s6 + $0x10] sm:$0xff]  ;;  %s181_s15 = scalar_lea.vmem %s658_s3, %s455_s10 }
   0xf   : > { %v511_v11 = vld [vmem:[%s172_s6 + $0x18] sm:$0xff] }
  0x10   : > { %279 = vmatpush.bf16.msra.mxu0 %v518_v1  ;;  %546 = vmatpush.bf16.msra.mxu1 %v518_v1 }
  0x11   : > { %547 = vmatpush.bf16.msra.mxu2 %v518_v1  ;;  %548 = vmatpush.bf16.msra.mxu3 %v518_v1 }
  0x14   : > { %280 = vmatpush.bf16.msra.mxu0 %v517_v2  ;;  %549 = vmatpush.bf16.msra.mxu1 %v517_v2 }
  0x15   : > { %550 = vmatpush.bf16.msra.mxu2 %v517_v2  ;;  %551 = vmatpush.bf16.msra.mxu3 %v517_v2 }
  0x18   : > { %281 = vmatpush.bf16.msra.mxu0 %v516_v3  ;;  %552 = vmatpush.bf16.msra.mxu1 %v516_v3 }
  0x19   : > { %553 = vmatpush.bf16.msra.mxu2 %v516_v3  ;;  %554 = vmatpush.bf16.msra.mxu3 %v516_v3 }
  0x1c   : > { %282 = vmatpush.bf16.msra.mxu0 %v515_v4  ;;  %555 = vmatpush.bf16.msra.mxu1 %v515_v4 }
  0x1d   : > { %556 = vmatpush.bf16.msra.mxu2 %v515_v4  ;;  %557 = vmatpush.bf16.msra.mxu3 %v515_v4 }
  0x20   : > { %283 = vmatpush.bf16.msra.mxu0 %v514_v5  ;;  %558 = vmatpush.bf16.msra.mxu1 %v514_v5 }
  0x21   : > { %559 = vmatpush.bf16.msra.mxu2 %v514_v5  ;;  %560 = vmatpush.bf16.msra.mxu3 %v514_v5 }
  0x24   : > { %284 = vmatpush.bf16.msra.mxu0 %v513_v6  ;;  %561 = vmatpush.bf16.msra.mxu1 %v513_v6 }
  0x25   : > { %562 = vmatpush.bf16.msra.mxu2 %v513_v6  ;;  %563 = vmatpush.bf16.msra.mxu3 %v513_v6 }
  0x28   : > { %285 = vmatpush.bf16.msra.mxu0 %v512_v7  ;;  %564 = vmatpush.bf16.msra.mxu1 %v512_v7 }
  0x29   : > { %565 = vmatpush.bf16.msra.mxu2 %v512_v7  ;;  %566 = vmatpush.bf16.msra.mxu3 %v512_v7 }
  0x2b   : > { %286 = vmatmul.bf16.vlgmr.msra.gmra.mxu0 %v508_v8  ;;  %291 = vmatmul.bf16.vlgmr.msra.gmra.mxu1 %v509_v9 }
  0x2c   : > { %296 = vmatmul.bf16.vlgmr.msra.gmra.mxu2 %v510_v10  ;;  %301 = vmatmul.bf16.vlgmr.msra.gmra.mxu3 %v511_v11 }
  0xa8   : > { %v287_v12 = vpop.f32.mrf.mxu0  ;;  %v292_v13 = vpop.f32.mrf.mxu1 }
  0xa9   : > { %v336_v16 = vmul.f32 %v287_v12, %v287_v12  ;;  %v338_v23 = vmul.f32 %v292_v13, %v292_v13 }
  0xaf   : > { %v297_v14 = vpop.f32.mrf.mxu2  ;;  %v302_v15 = vpop.f32.mrf.mxu3 }
  0xb0   : > { %v289_v17 = vpop.f32.mrf.mxu0  ;;  %v294_v18 = vpop.f32.mrf.mxu1  ;;  %v340_v29 = vmul.f32 %v297_v14, %v297_v14  ;;  %v342_v39 = vmul.f32 %v302_v15, %v302_v15 }
  0xb1   : > { %v523_v19 = vpack.c.bf16 %v289_v17, %v287_v12  ;;  %v323_v20 = vadd.f32 %v289_v17, %v287_v12  ;;  %v337_v21 = vmul.f32 %v289_v17, %v289_v17  ;;  %v528_v22 = vpack.c.bf16 %v294_v18, %v292_v13 }
  0xb2   : > { %v339_v27 = vmul.f32 %v294_v18, %v294_v18 }
  0xb3   : > { %524 = vst [vmem:[%s177_s9] sm:$0xff] %v523_v19   ;;  %v344_v24 = vadd.f32 %v337_v21, %v336_v16  ;;  %v324_v25 = vadd.f32 %v323_v20, %v292_v13 }
  0xb4   : > { %540 = vst [vmem:[%s177_s9 + $0x8] sm:$0xff] %v528_v22  }
  0xb5   : > { %v325_v26 = vadd.f32 %v324_v25, %v294_v18  ;;  %v345_v28 = vadd.f32 %v344_v24, %v338_v23 }
  0xb7   : > { %v346_v30 = vadd.f32 %v345_v28, %v339_v27  ;;  %v299_v31 = vpop.f32.mrf.mxu2  ;;  %v326_v32 = vadd.f32 %v325_v26, %v297_v14  ;;  %v304_v33 = vpop.f32.mrf.mxu3 }
  0xb8   : > { %v533_v34 = vpack.c.bf16 %v299_v31, %v297_v14  ;;  %v538_v35 = vpack.c.bf16 %v304_v33, %v302_v15  ;;  %v341_v37 = vmul.f32 %v299_v31, %v299_v31  ;;  %v343_v43 = vmul.f32 %v304_v33, %v304_v33 }
  0xb9   : > { %v327_v36 = vadd.f32 %v326_v32, %v299_v31  ;;  %v347_v38 = vadd.f32 %v346_v30, %v340_v29 }
  0xba   : > { %541 = vst [vmem:[%s177_s9 + $0x10] sm:$0xff] %v533_v34  }
  0xbb   : > { %v348_v40 = vadd.f32 %v347_v38, %v341_v37  ;;  %542 = vst [vmem:[%s177_s9 + $0x18] sm:$0xff] %v538_v35   ;;  %v328_v41 = vadd.f32 %v327_v36, %v302_v15 }
  0xbd   : > { %v329_v42 = vadd.f32 %v328_v41, %v304_v33  ;;  %v349_v44 = vadd.f32 %v348_v40, %v342_v39 }
  0xbf   : > { %v330_v45 = vrot.slane %v329_v42, 4  ;;  %v350_v46 = vadd.f32 %v349_v44, %v343_v43 }
  0xc1   : > { %v331_v47 = vadd.f32 %v330_v45, %v329_v42  ;;  %v351_v48 = vrot.slane %v350_v46, 4 }
  0xc3   : > { %v332_v49 = vrot.slane %v331_v47, 2  ;;  %v352_v50 = vadd.f32 %v351_v48, %v350_v46 }
  0xc5   : > { %v333_v51 = vadd.f32 %v332_v49, %v331_v47  ;;  %v353_v52 = vrot.slane %v352_v50, 2 }
  0xc7   : > { %v334_v53 = vrot.slane %v333_v51, 1  ;;  %v354_v54 = vadd.f32 %v353_v52, %v352_v50 }
  0xc9   : > { %v355_v55 = vrot.slane %v354_v54, 1  ;;  %v335_v56 = vadd.f32 %v334_v53, %v333_v51 }
  0xcb   : > { %v356_v57 = vadd.f32 %v355_v55, %v354_v54 }
  0xcd   : > { %v358_v58 = vsel %vm357_vm0, %v335_v56, %v356_v57 }
  0xce   : > { %359 = vst [vmem:[%s181_s15] sm:$0x3] %v358_v58 }
  0xcf PF: > { %s14_s12 = sadd.s32 1, %s581_s12  }
  0xd0   : > { %p11_p4 = scmp.ge.s32.totalorder %s14_s12, 4  }
  0xd2   :  { %13 = sbr.rel (!%p11_p4) target bundleno = 1 (0x1), region = 70 }

// kernel: resblock_forward.6
= control target key start
LH: loop header
LB: loop body
LE: loop exit
PB: predicated region body
PF: predicated region fallthrough
CT: control target
= control target key end

     0   :  { %s547_s12 = smov 0   ;;  %s640_s0 = inlined_call_operand.vmem [shape: bf16[2,64,128], index: 0, kind: input, shape index: {}]   ;;  %s641_s1 = inlined_call_operand.vmem [shape: f32[1,128], index: 1, kind: input, shape index: {}]   ;;  %s642_s2 = inlined_call_operand.vmem [shape: f32[1,128], index: 2, kind: input, shape index: {}]   ;;  %s643_s3 = inlined_call_operand.vmem [shape: bf16[2,10,10,128], index: 3, kind: output, shape index: {}]  }
   0x1 LB: > { %s476_s13 = sadd.s32 4294967295, %s524_s12   ;;  %p480_p0 = scmp.ge.s32.totalorder %s524_s12, 1  ;;  %s524_s12 = sphi %s547_s12, %s13_s12  }
   0x2   : > { %p137_p1 = scmp.lt.s32.totalorder %s524_s12, 3 }
   0x4   : > { %p138_p2 = pnand %p480_p0, %p137_p1 }
   0x5   : > { %p161_p3 = scmp.lt.s32.totalorder (!%p138_p2), %s476_s13, 1 }
   0x6   : > { %141 = sbr.rel (%p138_p2) target bundleno = 58 (0x3a), region = 32 }
   0xb   : > { %v526_v0 = vmov 0   ;;  %s649_s13 = smov (!%p161_p3, %s476_s13), 1  ;;  %v516_v5 = vld [vmem:[%s641_s1] ss:$0 sm:$0xff]  ;;  %vm316_vm0 = vcmask 1040384   ;;  %vm327_vm2 = vcmask 1044480  }
   0xc   : > { %v347_v1 = vunpack.c.l.b16 %v526_v0  ;;  %v348_v2 = vunpack.c.h.b16 %v526_v0  ;;  %s506_s14 = smul.u32 80, %s649_s13  ;;  %s486_s15 = sshll.u32 %s649_s13, 5  ;;  %v517_v10 = vld [vmem:[%s642_s2] ss:$0 sm:$0xff]  ;;  %vm317_vm1 = vsmask.f32 256 }
   0xd   : > { %s165_s18 = scalar_lea.vmem %s640_s0, %s486_s15  ;;  %vm328_vm3 = vsmask.f32 4352  ;;  %vm577_vm4 = vmand %vm316_vm0, %vm317_vm1 }
   0xe   : > { %v365_v3 = vpack.c.b16 %v347_v1, %v347_v1  ;;  %v366_v4 = vpack.c.b16 %v348_v2, %v348_v2  ;;  %s564_s23 = scalar_lea.vmem %s643_s3, %s506_s14  ;;  %v488_v6 = vld [vmem:[%s165_s18] sm:$0xff]   ;;  %v503_v7 = vld [vmem:[%s165_s18 + $0x8] sm:$0xff]   ;;  %v504_v8 = vld [vmem:[%s165_s18 + $0x10] sm:$0xff]  }
   0xf   : > { %v489_v9 = vunpack.c.l.bf16 %v488_v6  ;;  %v490_v11 = vunpack.c.h.bf16 %v488_v6  ;;  %v493_v12 = vunpack.c.l.bf16 %v503_v7  ;;  %v494_v13 = vunpack.c.h.bf16 %v503_v7  ;;  %v505_v14 = vld [vmem:[%s165_s18 + $0x18] sm:$0xff]   ;;  %vm583_vm5 = vmand %vm327_vm2, %vm328_vm3 }
  0x10   : > { %401 = vst [vmem:[%s564_s23] sm:$0xf] %v365_v3  ;;  %v497_v15 = vunpack.c.l.bf16 %v504_v8  ;;  %v498_v16 = vunpack.c.h.bf16 %v504_v8  ;;  %v501_v17 = vunpack.c.l.bf16 %v505_v14  ;;  %v502_v18 = vunpack.c.h.bf16 %v505_v14 }
  0x11   : > { %419 = vst [vmem:[%s564_s23 + $0x48] sm:$0xf] %v365_v3  ;;  %v192_v19 = vmul.f32 %v516_v5, %v489_v9  ;;  %v193_v20 = vmul.f32 %v516_v5, %v490_v11  ;;  %v194_v21 = vmul.f32 %v516_v5, %v493_v12  ;;  %v195_v22 = vmul.f32 %v516_v5, %v494_v13 }
  0x12   : > { %402 = vst [vmem:[%s564_s23 + $0x4] sm:$0x1] %v366_v4  ;;  %v196_v23 = vmul.f32 %v516_v5, %v497_v15  ;;  %v197_v24 = vmul.f32 %v516_v5, %v498_v16  ;;  %v198_v25 = vmul.f32 %v516_v5, %v501_v17  ;;  %v199_v26 = vmul.f32 %v516_v5, %v502_v18 }
  0x13   : > { %420 = vst [vmem:[%s564_s23 + $0x4c] sm:$0x1] %v366_v4  ;;  %v204_v27 = vadd.f32 %v517_v10, %v192_v19  ;;  %v205_v28 = vadd.f32 %v517_v10, %v193_v20  ;;  %v206_v29 = vadd.f32 %v517_v10, %v194_v21  ;;  %v207_v30 = vadd.f32 %v517_v10, %v195_v22 }
  0x14   : > { %v208_v31 = vadd.f32 %v517_v10, %v196_v23  ;;  %v209_v32 = vadd.f32 %v517_v10, %v197_v24  ;;  %v210_v33 = vadd.f32 %v517_v10, %v198_v25  ;;  %v211_v34 = vadd.f32 %v517_v10, %v199_v26 }
  0x15   : > { %v212_v35 = vmax.f32 %v204_v27, 0.0  ;;  %v213_v36 = vmax.f32 %v205_v28, 0.0  ;;  %v214_v37 = vmax.f32 %v206_v29, 0.0  ;;  %v215_v38 = vmax.f32 %v207_v30, 0.0 }
  0x16   : > { %v216_v39 = vmax.f32 %v208_v31, 0.0  ;;  %v217_v40 = vmax.f32 %v209_v32, 0.0  ;;  %v218_v41 = vmax.f32 %v210_v33, 0.0  ;;  %v219_v42 = vmax.f32 %v211_v34, 0.0 }
  0x17   : > { %v220_v43 = vpack.c.bf16 %v212_v35, %v212_v35  ;;  %v221_v44 = vpack.c.bf16 %v213_v36, %v213_v36  ;;  %v222_v45 = vpack.c.bf16 %v214_v37, %v214_v37  ;;  %v223_v46 = vpack.c.bf16 %v215_v38, %v215_v38 }
  0x18   : > { %v224_v47 = vpack.c.bf16 %v216_v39, %v216_v39  ;;  %v225_v48 = vpack.c.bf16 %v217_v40, %v217_v40  ;;  %v226_v49 = vpack.c.bf16 %v218_v41, %v218_v41  ;;  %v227_v50 = vpack.c.bf16 %v219_v42, %v219_v42 }
  0x19   : > { %v236_v51 = vunpack.c.l.b16 %v220_v43  ;;  %v237_v52 = vunpack.c.l.b16 %v221_v44  ;;  %v238_v53 = vunpack.c.l.b16 %v222_v45  ;;  %v239_v54 = vunpack.c.l.b16 %v223_v46 }
  0x1a   : > { %v240_v55 = vunpack.c.l.b16 %v224_v47  ;;  %v241_v56 = vunpack.c.l.b16 %v225_v48  ;;  %v242_v57 = vunpack.c.l.b16 %v226_v49  ;;  %v243_v58 = vunpack.c.l.b16 %v227_v50 }
  0x1b   : > { %v244_v59 = vpack.c.b16 %v236_v51, %v236_v51  ;;  %v245_v60 = vpack.c.b16 %v237_v52, %v237_v52  ;;  %v246_v61 = vpack.c.b16 %v238_v53, %v238_v53  ;;  %v247_v62 = vpack.c.b16 %v239_v54, %v239_v54 }
  0x1c   : > { %v248_v63 = vpack.c.b16 %v240_v55, %v240_v55  ;;  %v249_v0 = vpack.c.b16 %v241_v56, %v241_v56  ;;  %v250_v1 = vpack.c.b16 %v242_v57, %v242_v57  ;;  %v573_v2 = vpack.c.b16 %v243_v58, %v243_v58 }
  0x1d   : > { %v253_v3 = vshrl.u32 %v244_v59, 16  ;;  %v256_v4 = vshll.u32 %v244_v59, 16  ;;  %v260_v5 = vshrl.u32 %v245_v60, 16  ;;  %v263_v6 = vshll.u32 %v245_v60, 16 }
  0x1e   : > { %v267_v7 = vshrl.u32 %v246_v61, 16  ;;  %v270_v8 = vshll.u32 %v246_v61, 16  ;;  %v274_v9 = vshrl.u32 %v247_v62, 16  ;;  %v277_v10 = vshll.u32 %v247_v62, 16 }
  0x1f   : > { %v255_v11 = vrot.slane %v253_v3, 7  ;;  %v262_v12 = vrot.slane %v260_v5, 7  ;;  %v281_v13 = vshrl.u32 %v248_v63, 16  ;;  %v284_v14 = vshll.u32 %v248_v63, 16 }
  0x20   : > { %v269_v16 = vrot.slane %v267_v7, 7  ;;  %v276_v17 = vrot.slane %v274_v9, 7  ;;  %v288_v18 = vshrl.u32 %v249_v0, 16  ;;  %v291_v19 = vshll.u32 %v249_v0, 16 }
  0x21   : > { %v258_v20 = vor.u32 %v256_v4, %v255_v11  ;;  %v265_v22 = vor.u32 %v263_v6, %v262_v12  ;;  %v283_v23 = vrot.slane %v281_v13, 7  ;;  %v295_v24 = vshrl.u32 %v250_v1, 16 }
  0x22   : > { %v272_v25 = vor.u32 %v270_v8, %v269_v16  ;;  %v279_v26 = vor.u32 %v277_v10, %v276_v17  ;;  %v290_v27 = vrot.slane %v288_v18, 7  ;;  %v298_v28 = vshll.u32 %v250_v1, 16 }
  0x23   : > { %v319_v29 = vsel %vm577_vm4, 0, %v258_v20  ;;  %v320_v30 = vsel %vm577_vm4, 0, %v265_v22  ;;  %v286_v31 = vor.u32 %v284_v14, %v283_v23  ;;  %v297_v32 = vrot.slane %v295_v24, 7 }
  0x24   : > { %v330_v33 = vsel %vm583_vm5, %v319_v29, 0  ;;  %v331_v34 = vsel %vm583_vm5, %v320_v30, 0  ;;  %v321_v35 = vsel %vm577_vm4, 0, %v272_v25  ;;  %v322_v36 = vsel %vm577_vm4, 0, %v279_v26 }
  0x25   : > { %v349_v37 = vunpack.c.l.b16 %v330_v33  ;;  %v350_v38 = vunpack.c.h.b16 %v330_v33  ;;  %v351_v39 = vunpack.c.l.b16 %v331_v34  ;;  %v352_v40 = vunpack.c.h.b16 %v331_v34 }
  0x26   : > { %v332_v41 = vsel %vm583_vm5, %v321_v35, 0  ;;  %v333_v42 = vsel %vm583_vm5, %v322_v36, 0  ;;  %v323_v43 = vsel %vm577_vm4, 0, %v286_v31  ;;  %v293_v44 = vor.u32 %v291_v19, %v290_v27 }
  0x27   : > { %v367_v45 = vpack.c.b16 %v349_v37, %v349_v37  ;;  %v368_v46 = vpack.c.b16 %v350_v38, %v350_v38  ;;  %v369_v47 = vpack.c.b16 %v351_v39, %v351_v39  ;;  %v370_v48 = vpack.c.b16 %v352_v40, %v352_v40 }
  0x28   : > { %v353_v49 = vunpack.c.l.b16 %v332_v41  ;;  %v354_v50 = vunpack.c.h.b16 %v332_v41  ;;  %v355_v51 = vunpack.c.l.b16 %v333_v42  ;;  %v356_v52 = vunpack.c.h.b16 %v333_v42 }
  0x29   : > { %403 = vst [vmem:[%s564_s23 + $0x8] sm:$0xf] %v367_v45  ;;  %v334_v53 = vsel %vm583_vm5, %v323_v43, 0  ;;  %v324_v54 = vsel %vm577_vm4, 0, %v293_v44  ;;  %v300_v55 = vor.u32 %v298_v28, %v297_v32  ;;  %v302_v56 = vshrl.u32 %v573_v2, 16 }
  0x2a   : > { %404 = vst [vmem:[%s564_s23 + $0xc] sm:$0x1] %v368_v46  ;;  %v371_v57 = vpack.c.b16 %v353_v49, %v353_v49  ;;  %v372_v58 = vpack.c.b16 %v354_v50, %v354_v50  ;;  %v373_v59 = vpack.c.b16 %v355_v51, %v355_v51  ;;  %v374_v60 = vpack.c.b16 %v356_v52, %v356_v52 }
  0x2b   : > { %405 = vst [vmem:[%s564_s23 + $0x10] sm:$0xf] %v369_v47  ;;  %v357_v61 = vunpack.c.l.b16 %v334_v53  ;;  %v358_v62 = vunpack.c.h.b16 %v334_v53  ;;  %v335_v63 = vsel %vm583_vm5, %v324_v54, 0  ;;  %v325_v0 = vsel %vm577_vm4, 0, %v300_v55 }
  0x2c   : > { %406 = vst [vmem:[%s564_s23 + $0x14] sm:$0x1] %v370_v48  ;;  %v359_v1 = vunpack.c.l.b16 %v335_v63  ;;  %v360_v3 = vunpack.c.h.b16 %v335_v63  ;;  %v336_v4 = vsel %vm583_vm5, %v325_v0, 0  ;;  %v304_v5 = vrot.slane %v302_v56, 7 }
  0x2d   : > { %407 = vst [vmem:[%s564_s23 + $0x18] sm:$0xf] %v371_v57  ;;  %v375_v6 = vpack.c.b16 %v357_v61, %v357_v61  ;;  %v361_v7 = vunpack.c.l.b16 %v336_v4  ;;  %v376_v8 = vpack.c.b16 %v358_v62, %v358_v62  ;;  %v362_v9 = vunpack.c.h.b16 %v336_v4 }
  0x2e   : > { %408 = vst [vmem:[%s564_s23 + $0x1c] sm:$0x1] %v372_v58  ;;  %v305_v10 = vshll.u32 %v573_v2, 16  ;;  %v377_v11 = vpack.c.b16 %v359_v1, %v359_v1  ;;  %v378_v12 = vpack.c.b16 %v360_v3, %v360_v3 }
  0x2f   : > { %409 = vst [vmem:[%s564_s23 + $0x20] sm:$0xf] %v373_v59  ;;  %v379_v14 = vpack.c.b16 %v361_v7, %v361_v7  ;;  %v380_v16 = vpack.c.b16 %v362_v9, %v362_v9 }
  0x30   : > { %410 = vst [vmem:[%s564_s23 + $0x24] sm:$0x1] %v374_v60  ;;  %v307_v13 = vor.u32 %v305_v10, %v304_v5 }
  0x31   : > { %411 = vst [vmem:[%s564_s23 + $0x28] sm:$0xf] %v375_v6 }
  0x32   : > { %412 = vst [vmem:[%s564_s23 + $0x2c] sm:$0x1] %v376_v8  ;;  %v326_v17 = vsel %vm577_vm4, 0, %v307_v13 }
  0x33   : > { %413 = vst [vmem:[%s564_s23 + $0x30] sm:$0xf] %v377_v11  ;;  %v337_v2 = vsel %vm583_vm5, %v326_v17, 0 }
  0x34   : > { %414 = vst [vmem:[%s564_s23 + $0x34] sm:$0x1] %v378_v12  ;;  %v363_v18 = vunpack.c.l.b16 %v337_v2  ;;  %v364_v19 = vunpack.c.h.b16 %v337_v2 }
  0x35   : > { %415 = vst [vmem:[%s564_s23 + $0x38] sm:$0xf] %v379_v14 }
  0x36   : > { %416 = vst [vmem:[%s564_s23 + $0x3c] sm:$0x1] %v380_v16  ;;  %v381_v20 = vpack.c.b16 %v363_v18, %v363_v18  ;;  %v382_v22 = vpack.c.b16 %v364_v19, %v364_v19 }
  0x38   : > { %417 = vst [vmem:[%s564_s23 + $0x40] sm:$0xf] %v381_v20 }
  0x39   : > { %418 = vst [vmem:[%s564_s23 + $0x44] sm:$0x1] %v382_v22 }
  0x3a PF: > { %s13_s12 = sadd.s32 1, %s524_s12  }
  0x3b   : > { %p10_p4 = scmp.ge.s32.totalorder %s13_s12, 4  }
  0x3d   :  { %12 = sbr.rel (!%p10_p4) target bundleno = 1 (0x1), region = 62 }

// kernel: resblock_forward.9
= control target key start
LH: loop header
LB: loop body
LE: loop exit
PB: predicated region body
PF: predicated region fallthrough
CT: control target
= control target key end

     0   :  { %s552_s21 = smov 0   ;;  %s640_s0 = inlined_call_operand.vmem [shape: bf16[2,64,128], index: 0, kind: input, shape index: {}]   ;;  %s641_s1 = inlined_call_operand.vmem [shape: f32[1,128], index: 1, kind: input, shape index: {}]   ;;  %s642_s2 = inlined_call_operand.vmem [shape: f32[1,128], index: 2, kind: input, shape index: {}]   ;;  %s643_s3 = inlined_call_operand.vmem [shape: bf16[2,64,128], index: 3, kind: input, shape index: {}]   ;;  %s644_s4 = inlined_call_operand.vmem [shape: f32[1,128], index: 4, kind: input, shape index: {}]   ;;  %s645_s5 = inlined_call_operand.vmem [shape: f32[1,128], index: 5, kind: input, shape index: {}]   ;;  %s646_s6 = inlined_call_operand.vmem [shape: f32[2,64,128], index: 6, kind: output, shape index: {}]  }
   0x1 LB: > { %s443_s22 = sadd.s32 4294967295, %s515_s21   ;;  %p447_p0 = scmp.ge.s32.totalorder %s515_s21, 1  ;;  %s515_s21 = sphi %s552_s21, %s16_s21  }
   0x2   : > { %p222_p1 = scmp.lt.s32.totalorder %s515_s21, 3 }
   0x4   : > { %p223_p2 = pnand %p447_p0, %p222_p1 }
   0x5   : > { %p257_p3 = scmp.lt.s32.totalorder (!%p223_p2), %s443_s22, 1 }
   0x6   : > { %226 = sbr.rel (%p223_p2) target bundleno = 40 (0x28), region = 44 }
   0xb   : > { %s648_s22 = smov (!%p257_p3, %s443_s22), 1  ;;  %v576_v0 = vld [vmem:[%s641_s1] ss:$0 sm:$0xff] }
   0xc   : > { %s456_s23 = sshll.u32 %s648_s22, 5  ;;  %v581_v1 = vld [vmem:[%s644_s4] ss:$0 sm:$0xff]  ;;  %s458_s14 = sshll.u32 %s648_s22, 6 }
   0xd   : > { %s566_s26 = scalar_lea.vmem %s640_s0, %s456_s23  ;;  %s571_s29 = scalar_lea.vmem %s643_s3, %s456_s23  ;;  %v589_v6 = vld [vmem:[%s642_s2] ss:$0 sm:$0xff] }
   0xe   : > { %v460_v2 = vld [vmem:[%s566_s26] sm:$0xff]   ;;  %v491_v4 = vld [vmem:[%s566_s26 + $0x8] sm:$0xff]   ;;  %v492_v15 = vld [vmem:[%s566_s26 + $0x10] sm:$0xff]   ;;  %s620_s17 = scalar_lea.vmem %s646_s6, %s458_s14 }
   0xf   : > { %v476_v3 = vld [vmem:[%s571_s29] sm:$0xff]   ;;  %v461_v5 = vunpack.c.l.bf16 %v460_v2  ;;  %v462_v8 = vunpack.c.h.bf16 %v460_v2  ;;  %v494_v10 = vld [vmem:[%s571_s29 + $0x8] sm:$0xff]   ;;  %v465_v11 = vunpack.c.l.bf16 %v491_v4  ;;  %v466_v13 = vunpack.c.h.bf16 %v491_v4  ;;  %v495_v16 = vld [vmem:[%s571_s29 + $0x10] sm:$0xff]  }
  0x10   : > { %v477_v7 = vunpack.c.l.bf16 %v476_v3  ;;  %v478_v9 = vunpack.c.h.bf16 %v476_v3  ;;  %v481_v12 = vunpack.c.l.bf16 %v494_v10  ;;  %v482_v14 = vunpack.c.h.bf16 %v494_v10  ;;  %v508_v26 = vld [vmem:[%s645_s5] ss:$0 sm:$0xff]  ;;  %v493_v34 = vld [vmem:[%s566_s26 + $0x18] sm:$0xff]  }
  0x11   : > { %v292_v17 = vmul.f32 %v576_v0, %v461_v5  ;;  %v293_v19 = vmul.f32 %v576_v0, %v462_v8  ;;  %v294_v21 = vmul.f32 %v576_v0, %v465_v11  ;;  %v295_v23 = vmul.f32 %v576_v0, %v466_v13  ;;  %v496_v39 = vld [vmem:[%s571_s29 + $0x18] sm:$0xff]  }
  0x12   : > { %v332_v18 = vmul.f32 %v581_v1, %v477_v7  ;;  %v333_v20 = vmul.f32 %v581_v1, %v478_v9  ;;  %v334_v22 = vmul.f32 %v581_v1, %v481_v12  ;;  %v335_v24 = vmul.f32 %v581_v1, %v482_v14 }
  0x13   : > { %v304_v25 = vadd.f32 %v589_v6, %v292_v17  ;;  %v305_v27 = vadd.f32 %v589_v6, %v293_v19  ;;  %v469_v28 = vunpack.c.l.bf16 %v492_v15  ;;  %v485_v29 = vunpack.c.l.bf16 %v495_v16 }
  0x14   : > { %v306_v30 = vadd.f32 %v589_v6, %v294_v21  ;;  %v307_v31 = vadd.f32 %v589_v6, %v295_v23  ;;  %v470_v32 = vunpack.c.h.bf16 %v492_v15  ;;  %v486_v33 = vunpack.c.h.bf16 %v495_v16 }
  0x15   : > { %v340_v35 = vadd.f32 %v332_v18, %v304_v25  ;;  %v341_v36 = vadd.f32 %v333_v20, %v305_v27  ;;  %v296_v37 = vmul.f32 %v576_v0, %v469_v28  ;;  %v336_v38 = vmul.f32 %v581_v1, %v485_v29 }
  0x16   : > { %v342_v40 = vadd.f32 %v334_v22, %v306_v30  ;;  %v343_v41 = vadd.f32 %v335_v24, %v307_v31  ;;  %v297_v42 = vmul.f32 %v576_v0, %v470_v32  ;;  %v337_v43 = vmul.f32 %v581_v1, %v486_v33 }
  0x17   : > { %v352_v44 = vadd.f32 %v508_v26, %v340_v35  ;;  %v353_v45 = vadd.f32 %v508_v26, %v341_v36  ;;  %v308_v46 = vadd.f32 %v589_v6, %v296_v37  ;;  %v473_v47 = vunpack.c.l.bf16 %v493_v34 }
  0x18   : > { %v354_v48 = vadd.f32 %v508_v26, %v342_v40  ;;  %v355_v49 = vadd.f32 %v508_v26, %v343_v41  ;;  %v309_v50 = vadd.f32 %v589_v6, %v297_v42  ;;  %v489_v51 = vunpack.c.l.bf16 %v496_v39 }
  0x19   : > { %v360_v52 = vmax.f32 %v352_v44, 0.0  ;;  %v361_v53 = vmax.f32 %v353_v45, 0.0  ;;  %v344_v54 = vadd.f32 %v336_v38, %v308_v46  ;;  %v298_v55 = vmul.f32 %v576_v0, %v473_v47 }
  0x1a   : > { %v362_v56 = vmax.f32 %v354_v48, 0.0  ;;  %v363_v57 = vmax.f32 %v355_v49, 0.0  ;;  %v345_v58 = vadd.f32 %v337_v43, %v309_v50  ;;  %v338_v59 = vmul.f32 %v581_v1, %v489_v51 }
  0x1b   : > { %368 = vst [vmem:[%s620_s17] sm:$0xff] %v360_v52  ;;  %v356_v60 = vadd.f32 %v508_v26, %v344_v54  ;;  %v310_v61 = vadd.f32 %v589_v6, %v298_v55  ;;  %v474_v62 = vunpack.c.h.bf16 %v493_v34  ;;  %v490_v63 = vunpack.c.h.bf16 %v496_v39 }
  0x1c   : > { %369 = vst [vmem:[%s620_s17 + $0x8] sm:$0xff] %v361_v53  ;;  %v357_v2 = vadd.f32 %v508_v26, %v345_v58 }
  0x1d   : > { %370 = vst [vmem:[%s620_s17 + $0x10] sm:$0xff] %v362_v56  ;;  %v364_v3 = vmax.f32 %v356_v60, 0.0  ;;  %v346_v4 = vadd.f32 %v338_v59, %v310_v61  ;;  %v299_v5 = vmul.f32 %v576_v0, %v474_v62  ;;  %v339_v7 = vmul.f32 %v581_v1, %v490_v63 }
  0x1e   : > { %371 = vst [vmem:[%s620_s17 + $0x18] sm:$0xff] %v363_v57  ;;  %v365_v8 = vmax.f32 %v357_v2, 0.0 }
  0x1f   : > { %372 = vst [vmem:[%s620_s17 + $0x20] sm:$0xff] %v364_v3  ;;  %v358_v9 = vadd.f32 %v508_v26, %v346_v4  ;;  %v311_v10 = vadd.f32 %v589_v6, %v299_v5 }
  0x20   : > { %373 = vst [vmem:[%s620_s17 + $0x28] sm:$0xff] %v365_v8 }
  0x21   : > { %v366_v11 = vmax.f32 %v358_v9, 0.0  ;;  %v347_v12 = vadd.f32 %v339_v7, %v311_v10 }
  0x23   : > { %374 = vst [vmem:[%s620_s17 + $0x30] sm:$0xff] %v366_v11  ;;  %v359_v13 = vadd.f32 %v508_v26, %v347_v12 }
  0x25   : > { %v367_v14 = vmax.f32 %v359_v13, 0.0 }
  0x27   : > { %375 = vst [vmem:[%s620_s17 + $0x38] sm:$0xff] %v367_v14 }
  0x28 PF: > { %s16_s21 = sadd.s32 1, %s515_s21  }
  0x29   : > { %p13_p4 = scmp.ge.s32.totalorder %s16_s21, 4  }
  0x2b   :  { %15 = sbr.rel (!%p13_p4) target bundleno = 1 (0x1), region = 77 }

// kernel: resblock_forward.7
= control target key start
LH: loop header
LB: loop body
LE: loop exit
PB: predicated region body
PF: predicated region fallthrough
CT: control target
= control target key end

     0   :  { %s2690_s12 = smov 0   ;;  %s3303_s0 = inlined_call_operand.vmem [shape: bf16[2,10,10,128], index: 0, kind: input, shape index: {}]   ;;  %s3304_s1 = inlined_call_operand.vmem [shape: bf16[9,128,128], index: 1, kind: input, shape index: {}]   ;;  %s3305_s2 = inlined_call_operand.vmem [shape: bf16[2,64,128], index: 2, kind: output, shape index: {0}]   ;;  %s3306_s3 = inlined_call_operand.vmem [shape: f32[2,2,128], index: 3, kind: output, shape index: {1}]  }
   0x1 LB: > { %s1966_s13 = sadd.s32 4294967295, %s2668_s12   ;;  %p1970_p0 = scmp.ge.s32.totalorder %s2668_s12, 1  ;;  %s2668_s12 = sphi %s2690_s12, %s14_s12  }
   0x2   : > { %p140_p1 = scmp.lt.s32.totalorder %s2668_s12, 3 }
   0x4   : > { %p141_p2 = pnand %p1970_p0, %p140_p1 }
   0x5   : > { %p168_p3 = scmp.lt.s32.totalorder (!%p141_p2), %s1966_s13, 1 }
   0x6   : > { %144 = sbr.rel (%p141_p2) target bundleno = 347 (0x15b), region = 28 }
   0xb   : > { %v2549_v0 = vld [vmem:[%s3304_s1 + $0x78] sm:$0xff]  ;;  %v2548_v2 = vld [vmem:[%s3304_s1 + $0x70] sm:$0xff]  ;;  %s3312_s13 = smov (!%p168_p3, %s1966_s13), 1  ;;  %v2547_v6 = vld [vmem:[%s3304_s1 + $0x68] sm:$0xff]  ;;  %vm214_vm0 = vsmask.f32 3328 }
   0xc   : > { %v2557_v1 = vld [vmem:[%s3304_s1 + $0xb8] sm:$0xff]  ;;  %2637 = vmatpush.bf16.msra.mxu1 %v2549_v0  ;;  %410 = vmatpush.bf16.msra.mxu0 %v2549_v0  ;;  %v2556_v3 = vld [vmem:[%s3304_s1 + $0xb0] sm:$0xff]  ;;  %s2653_s24 = smul.u32 80, %s3312_s13  ;;  %v2555_v7 = vld [vmem:[%s3304_s1 + $0xa8] sm:$0xff]  ;;  %vm215_vm1 = vsmask.f32 7440 }
   0xd   : > { %680 = vmatpush.bf16.msra.mxu2 %v2557_v1  ;;  %v2569_v4 = vld [vmem:[%s3304_s1 + $0xf8] sm:$0xff]  ;;  %v2568_v5 = vld [vmem:[%s3304_s1 + $0xf0] sm:$0xff]  ;;  %v2546_v11 = vld [vmem:[%s3304_s1 + $0x60] sm:$0xff]  ;;  %vm564_vm2 = vcmask 1042432   ;;  %vm565_vm3 = vcmask 1046532   ;;  %s1974_s20 = sshll.u32 %s3312_s13, 1 }
   0xe   : > { %815 = vmatpush.bf16.msra.mxu3 %v2569_v4  ;;  %s2728_s6 = scalar_lea.vmem %s3303_s0, %s2653_s24  ;;  %v2554_v16 = vld [vmem:[%s3304_s1 + $0xa0] sm:$0xff]  ;;  %v2567_v17 = vld [vmem:[%s3304_s1 + $0xe8] sm:$0xff]  ;;  %v2545_v29 = vld [vmem:[%s3304_s1 + $0x58] sm:$0xff]  ;;  %vm1877_vm6 = vcmask 1040384   ;;  %s181_s23 = scalar_lea.vmem %s3306_s3, %s1974_s20 }
   0xf   : > { %v186_v8 = vld [vmem:[%s2728_s6 + $0x20] sm:$0xf]  ;;  %v187_v9 = vld [vmem:[%s2728_s6 + $0x28] sm:$0xf]  ;;  %v2733_v10 = vld [vmem:[%s2728_s6 + $0x24] sm:$0x1] }
  0x10   : > { %2638 = vmatpush.bf16.msra.mxu1 %v2548_v2  ;;  %411 = vmatpush.bf16.msra.mxu0 %v2548_v2  ;;  %v2739_v12 = vld [vmem:[%s2728_s6 + $0x2c] sm:$0x1]  ;;  %v274_v13 = vshrl.u32 %v186_v8, 16  ;;  %v277_v14 = vshll.u32 %v186_v8, 16  ;;  %v288_v15 = vshrl.u32 %v187_v9, 16  ;;  %v291_v18 = vshll.u32 %v187_v9, 16  ;;  %vm2766_vm4 = vmor %vm214_vm0, %vm215_vm1 }
  0x11   : > { %681 = vmatpush.bf16.msra.mxu2 %v2556_v3  ;;  %v182_v19 = vld [vmem:[%s2728_s6] sm:$0xf]  ;;  %v283_v22 = vshll.u32 %v2733_v10, 16  ;;  %v183_v24 = vld [vmem:[%s2728_s6 + $0x8] sm:$0xf]  ;;  %v297_v26 = vshll.u32 %v2739_v12, 16  ;;  %vm2775_vm5 = vmor %vm564_vm2, %vm565_vm3 }
  0x12   : > { %816 = vmatpush.bf16.msra.mxu3 %v2568_v5  ;;  %v276_v20 = vrot.slane %v274_v13, 4  ;;  %v279_v21 = vrot.slane %v277_v14, 5  ;;  %v290_v23 = vrot.slane %v288_v15, 4  ;;  %v293_v25 = vrot.slane %v291_v18, 5  ;;  %v206_v27 = vld [vmem:[%s2728_s6 + $0x4] sm:$0x1] }
  0x13   : > { %v207_v28 = vld [vmem:[%s2728_s6 + $0xc] sm:$0x1]  ;;  %v218_v31 = vshrl.u32 %v182_v19, 16  ;;  %v221_v32 = vshll.u32 %v182_v19, 16  ;;  %v2566_v34 = vld [vmem:[%s3304_s1 + $0xe0] sm:$0xff]  ;;  %v227_v35 = vshll.u32 %v206_v27, 16 }
  0x14   : > { %2639 = vmatpush.bf16.msra.mxu1 %v2547_v6  ;;  %412 = vmatpush.bf16.msra.mxu0 %v2547_v6  ;;  %v280_v30 = vor.u32 %v279_v21, %v276_v20  ;;  %v294_v33 = vor.u32 %v293_v25, %v290_v23  ;;  %v232_v36 = vshrl.u32 %v183_v24, 16  ;;  %v235_v37 = vshll.u32 %v183_v24, 16  ;;  %v540_v38 = vld [vmem:[%s2728_s6] sm:$0xe]  ;;  %v541_v43 = vld [vmem:[%s2728_s6 + $0x8] sm:$0xe] }
  0x15   : > { %682 = vmatpush.bf16.msra.mxu2 %v2555_v7  ;;  %v285_v39 = vrot.slane %v283_v22, 5  ;;  %v220_v40 = vrot.slane %v218_v31, 4  ;;  %v223_v41 = vrot.slane %v221_v32, 5  ;;  %v241_v42 = vshll.u32 %v207_v28, 16  ;;  %v2553_v44 = vld [vmem:[%s3304_s1 + $0x98] sm:$0xff]  ;;  %v2544_v60 = vld [vmem:[%s3304_s1 + $0x50] sm:$0xff] }
  0x16   : > { %817 = vmatpush.bf16.msra.mxu3 %v2567_v17  ;;  %v281_v45 = vrot.slane %v280_v30, 4  ;;  %v299_v46 = vrot.slane %v297_v26, 5  ;;  %v234_v47 = vrot.slane %v232_v36, 4  ;;  %v237_v48 = vrot.slane %v235_v37, 5  ;;  %v2565_v56 = vld [vmem:[%s3304_s1 + $0xd8] sm:$0xff]  ;;  %v2552_v0 = vld [vmem:[%s3304_s1 + $0x90] sm:$0xff] }
  0x17   : > { %v295_v50 = vrot.slane %v294_v33, 4  ;;  %v224_v51 = vor.u32 %v223_v41, %v220_v40  ;;  %v2071_v52 = vrot.slane %v540_v38, 9  ;;  %v569_v53 = vrot.slane %v206_v27, 5  ;;  %v188_v59 = vld [vmem:[%s2728_s6 + $0x30] sm:$0xf]  ;;  %v2543_v14 = vld [vmem:[%s3304_s1 + $0x48] sm:$0xff] }
  0x18   : > { %2640 = vmatpush.bf16.msra.mxu1 %v2546_v11  ;;  %413 = vmatpush.bf16.msra.mxu0 %v2546_v11  ;;  %v229_v54 = vrot.slane %v227_v35, 5  ;;  %v238_v55 = vor.u32 %v237_v48, %v234_v47  ;;  %v2072_v58 = vrot.slane %v541_v43, 9  ;;  %v243_v62 = vrot.slane %v241_v42, 5  ;;  %v189_v3 = vld [vmem:[%s2728_s6 + $0x38] sm:$0xf]  ;;  %v2564_v11 = vld [vmem:[%s3304_s1 + $0xd0] sm:$0xff] }
  0x19   : > { %683 = vmatpush.bf16.msra.mxu2 %v2554_v16  ;;  %v225_v61 = vrot.slane %v224_v51, 4  ;;  %v573_v63 = vrot.slane %v207_v28, 5  ;;  %v286_v1 = vsel %vm2766_vm4, %v281_v45, %v285_v39  ;;  %v300_v4 = vsel %vm2766_vm4, %v295_v50, %v299_v46  ;;  %v184_v7 = vld [vmem:[%s2728_s6 + $0x10] sm:$0xf]  ;;  %v2551_v19 = vld [vmem:[%s3304_s1 + $0x88] sm:$0xff]  ;;  %v2542_v24 = vld [vmem:[%s3304_s1 + $0x40] sm:$0xff] }
  0x1a   : > { %818 = vmatpush.bf16.msra.mxu3 %v2566_v34  ;;  %v239_v2 = vrot.slane %v238_v55, 4  ;;  %v570_v5 = vsel %vm2775_vm5, %v2071_v52, %v569_v53  ;;  %v302_v6 = vshrl.u32 %v188_v59, 16  ;;  %v305_v13 = vshll.u32 %v188_v59, 16  ;;  %v185_v22 = vld [vmem:[%s2728_s6 + $0x18] sm:$0xf]  ;;  %v2563_v31 = vld [vmem:[%s3304_s1 + $0xc8] sm:$0xff] }
  0x1b   : > { %v230_v8 = vsel %vm2766_vm4, %v225_v61, %v229_v54  ;;  %v574_v9 = vsel %vm2775_vm5, %v2072_v58, %v573_v63  ;;  %v2804_v15 = vunpack.c.l.b16 %v286_v1  ;;  %v316_v17 = vshrl.u32 %v189_v3, 16  ;;  %v2822_v32 = vld [vmem:[%s2728_s6 + $0x34] sm:$0x1]  ;;  %v2825_v36 = vld [vmem:[%s2728_s6 + $0x3c] sm:$0x1]  ;;  %v2550_v42 = vld [vmem:[%s3304_s1 + $0x80] sm:$0xff] }
  0x1c   : > { %2641 = vmatpush.bf16.msra.mxu1 %v2545_v29  ;;  %414 = vmatpush.bf16.msra.mxu0 %v2545_v29  ;;  %v244_v16 = vsel %vm2766_vm4, %v239_v2, %v243_v62  ;;  %v351_v18 = vunpack.c.l.b16 %v300_v4  ;;  %v616_v20 = vunpack.c.l.b16 %v570_v5  ;;  %v319_v21 = vshll.u32 %v189_v3, 16  ;;  %v2541_v29 = vld [vmem:[%s3304_s1 + $0x38] sm:$0xff]  ;;  %v2832_v43 = vld [vmem:[%s2728_s6 + $0x14] sm:$0x1]  ;;  %v2153_v62 = vld [vmem:[%s2728_s6 + $0x8] sm:$0xf] }
  0x1d   : > { %684 = vmatpush.bf16.msra.mxu2 %v2553_v44  ;;  %v246_v23 = vshrl.u32 %v184_v7, 16  ;;  %v346_v25 = vunpack.c.l.b16 %v230_v8  ;;  %v617_v26 = vunpack.c.l.b16 %v574_v9  ;;  %v304_v27 = vrot.slane %v302_v6, 4  ;;  %v2835_v44 = vld [vmem:[%s2728_s6 + $0x1c] sm:$0x1]  ;;  %v2558_v63 = vld [vmem:[%s2728_s6 + $0xc] sm:$0xf0] }
  0x1e   : > { %819 = vmatpush.bf16.msra.mxu3 %v2565_v56  ;;  %v249_v28 = vshll.u32 %v184_v7, 16  ;;  %v347_v30 = vunpack.c.l.b16 %v244_v16  ;;  %v307_v33 = vrot.slane %v305_v13, 5  ;;  %v318_v34 = vrot.slane %v316_v17, 4  ;;  %v2577_v45 = vld [vmem:[%s3304_s1 + $0x138] sm:$0xff]  ;;  %v2562_v56 = vld [vmem:[%s3304_s1 + $0xc0] sm:$0xff]  ;;  %v2576_v1 = vld [vmem:[%s3304_s1 + $0x130] sm:$0xff] }
  0x1f   : > { %v321_v35 = vrot.slane %v319_v21, 5  ;;  %v248_v37 = vrot.slane %v246_v23, 4  ;;  %v260_v39 = vshrl.u32 %v185_v22, 16  ;;  %v263_v40 = vshll.u32 %v185_v22, 16  ;;  %v2597_v48 = vld [vmem:[%s3304_s1 + $0x1b8] sm:$0xff]  ;;  %v2596_v6 = vld [vmem:[%s3304_s1 + $0x1b0] sm:$0xff] }
  0x20   : > { %2642 = vmatpush.bf16.msra.mxu1 %v2544_v60  ;;  %415 = vmatpush.bf16.msra.mxu0 %v2544_v60  ;;  %v251_v38 = vrot.slane %v249_v28, 5  ;;  %v356_v41 = vpack.c.b16 %v351_v18, %v2804_v15  ;;  %v624_v46 = vpack.c.b16 %v617_v26, %v616_v20  ;;  %v311_v47 = vshll.u32 %v2822_v32, 16  ;;  %v2605_v2 = vld [vmem:[%s3304_s1 + $0x1f8] sm:$0xff]  ;;  %v542_v4 = vld [vmem:[%s2728_s6 + $0x10] sm:$0xe]  ;;  %v2595_v26 = vld [vmem:[%s3304_s1 + $0x1a8] sm:$0xff] }
  0x21   : > { %685 = vmatpush.bf16.msra.mxu2 %v2552_v0  ;;  %v262_v50 = vrot.slane %v260_v39, 4  ;;  %v265_v51 = vrot.slane %v263_v40, 5  ;;  %v354_v52 = vpack.c.b16 %v347_v30, %v346_v25  ;;  %v308_v53 = vor.u32 %v307_v33, %v304_v27  ;;  %v2540_v0 = vld [vmem:[%s3304_s1 + $0x30] sm:$0xff]  ;;  %v543_v5 = vld [vmem:[%s2728_s6 + $0x18] sm:$0xe]  ;;  %v2575_v25 = vld [vmem:[%s3304_s1 + $0x128] sm:$0xff] }
  0x22   : > { %820 = vmatpush.bf16.msra.mxu3 %v2564_v11  ;;  %v322_v54 = vor.u32 %v321_v35, %v318_v34  ;;  %v325_v55 = vshll.u32 %v2825_v36, 16  ;;  %v252_v58 = vor.u32 %v251_v38, %v248_v37  ;;  %v255_v59 = vshll.u32 %v2832_v43, 16  ;;  %v2199_v13 = vld [vmem:[%s2728_s6 + $0x8] sm:$0xf]  ;;  %v2201_v18 = vld [vmem:[%s2728_s6 + $0x10] sm:$0xf] }
  0x23   : > { %v266_v60 = vor.u32 %v265_v51, %v262_v50  ;;  %v269_v61 = vshll.u32 %v2835_v44, 16  ;;  %v313_v3 = vrot.slane %v311_v47, 5  ;;  %v309_v7 = vrot.slane %v308_v53, 4  ;;  %v2538_v37 = vld [vmem:[%s3304_s1 + $0x20] sm:$0xff]  ;;  %v2603_v40 = vld [vmem:[%s3304_s1 + $0x1e8] sm:$0xff] }
  0x24   : > { %2643 = vmatpush.bf16.msra.mxu1 %v2543_v14  ;;  %416 = vmatpush.bf16.msra.mxu0 %v2543_v14  ;;  %v323_v8 = vrot.slane %v322_v54, 4  ;;  %v327_v9 = vrot.slane %v325_v55, 5  ;;  %v2154_v11 = vor.u32 %v2558_v63, %v2153_v62  ;;  %v253_v14 = vrot.slane %v252_v58, 4  ;;  %v2907_v47 = vld [vmem:[%s2728_s6 + $0xc] sm:$0x1]  ;;  %v2537_v55 = vld [vmem:[%s3304_s1 + $0x18] sm:$0xff] }
  0x25   : > { %686 = vmatpush.bf16.msra.mxu2 %v2551_v19  ;;  %v257_v15 = vrot.slane %v255_v59, 5  ;;  %v267_v16 = vrot.slane %v266_v60, 4  ;;  %v271_v17 = vrot.slane %v269_v61, 5  ;;  %v2539_v19 = vld [vmem:[%s3304_s1 + $0x28] sm:$0xff]  ;;  %v2073_v20 = vrot.slane %v542_v4, 9  ;;  %v2573_v58 = vld [vmem:[%s3304_s1 + $0x118] sm:$0xff] }
  0x26   : > { %821 = vmatpush.bf16.msra.mxu3 %v2563_v31  ;;  %v577_v21 = vrot.slane %v2832_v43, 5  ;;  %v2074_v22 = vrot.slane %v543_v5, 9  ;;  %v581_v23 = vrot.slane %v2835_v44, 5  ;;  %v314_v27 = vsel %vm2766_vm4, %v309_v7, %v313_v3  ;;  %v2574_v43 = vld [vmem:[%s3304_s1 + $0x120] sm:$0xff]  ;;  %v2157_v62 = vld [vmem:[%s2728_s6 + $0x18] sm:$0xf] }
  0x27   : > { %v328_v28 = vsel %vm2766_vm4, %v323_v8, %v327_v9  ;;  %v872_v30 = vshll.u32 %v2199_v13, 16  ;;  %v258_v31 = vsel %vm2766_vm4, %v253_v14, %v257_v15  ;;  %v272_v33 = vsel %vm2766_vm4, %v267_v16, %v271_v17  ;;  %v2594_v44 = vld [vmem:[%s3304_s1 + $0x1a0] sm:$0xff]  ;;  %v545_v5 = vld [vmem:[%s2728_s6 + $0x28] sm:$0xe]  ;;  %v2572_v7 = vld [vmem:[%s3304_s1 + $0x110] sm:$0xff] }
  0x28   : > { %2644 = vmatpush.bf16.msra.mxu1 %v2542_v24  ;;  %417 = vmatpush.bf16.msra.mxu0 %v2542_v24  ;;  %v2604_v24 = vld [vmem:[%s3304_s1 + $0x1f0] sm:$0xff]  ;;  %v883_v34 = vshrl.u32 %v2201_v18, 16  ;;  %v886_v35 = vshll.u32 %v2201_v18, 16  ;;  %v578_v38 = vsel %vm2775_vm5, %v2073_v20, %v577_v21  ;;  %v582_v39 = vsel %vm2775_vm5, %v2074_v22, %v581_v23  ;;  %v2559_v63 = vld [vmem:[%s2728_s6 + $0x1c] sm:$0xf0]  ;;  %v2593_v17 = vld [vmem:[%s3304_s1 + $0x198] sm:$0xff] }
  0x29   : > { %687 = vmatpush.bf16.msra.mxu2 %v2550_v42  ;;  %v353_v42 = vunpack.c.l.b16 %v328_v28  ;;  %v874_v50 = vrot.slane %v872_v30, 5  ;;  %v618_v51 = vunpack.c.l.b16 %v578_v38  ;;  %v878_v59 = vshll.u32 %v2907_v47, 16  ;;  %v2203_v20 = vld [vmem:[%s2728_s6 + $0x18] sm:$0xf]  ;;  %v2602_v21 = vld [vmem:[%s3304_s1 + $0x1e0] sm:$0xff]  ;;  %v2592_v23 = vld [vmem:[%s3304_s1 + $0x190] sm:$0xff] }
  0x2a   : > { %822 = vmatpush.bf16.msra.mxu3 %v2562_v56  ;;  %v885_v53 = vrot.slane %v883_v34, 4  ;;  %v888_v54 = vrot.slane %v886_v35, 5  ;;  %v2913_v56 = vld [vmem:[%s2728_s6 + $0x14] sm:$0x1]  ;;  %v2158_v8 = vor.u32 %v2559_v63, %v2157_v62  ;;  %v585_v14 = vrot.slane %v2733_v10, 5  ;;  %v2535_v10 = vld [vmem:[%s3304_s1 + $0x8] sm:$0xff] }
  0x2b   : > { %428 = vmatmul.bf16.vlgmr.msra.gmra.mxu1 %v356_v41  ;;  %418 = vmatmul.bf16.vlgmr.msra.gmra.mxu0 %v354_v52  ;;  %v352_v41 = vunpack.c.l.b16 %v314_v27  ;;  %v619_v52 = vunpack.c.l.b16 %v582_v39  ;;  %v892_v4 = vshll.u32 %v2913_v56, 16  ;;  %v880_v9 = vrot.slane %v878_v59, 5  ;;  %v2205_v22 = vld [vmem:[%s2728_s6 + $0x20] sm:$0xf]  ;;  %v2530_v39 = vld [vmem:[%s2728_s6 + $0x4] sm:$0xf0] }
  0x2c   : > { %511 = vmatpush.bf16.msrb.mxu1 %v2541_v29  ;;  %1061 = vmatpush.bf16.msrb.mxu0 %v2577_v45  ;;  %v869_v29 = vshrl.u32 %v2199_v13, 16  ;;  %v348_v45 = vunpack.c.l.b16 %v258_v31  ;;  %v889_v3 = vor.u32 %v888_v54, %v885_v53  ;;  %v2076_v15 = vrot.slane %v545_v5, 9  ;;  %v2534_v34 = vld [vmem:[%s3304_s1] sm:$0xff]  ;;  %v2584_v53 = vld [vmem:[%s3304_s1 + $0x170] sm:$0xff]  ;;  %v547_v5 = vld [vmem:[%s2728_s6 + $0x38] sm:$0xe] }
  0x2d   : > { %1370 = vmatpush.bf16.msrb.mxu2 %v2597_v48  ;;  %823 = vmatmul.bf16.vlgmr.msra.gmra.mxu3 %v2154_v11  ;;  %v357_v60 = vpack.c.b16 %v353_v42, %v352_v41  ;;  %v589_v16 = vrot.slane %v2739_v12, 5  ;;  %v2571_v12 = vld [vmem:[%s3304_s1 + $0x108] sm:$0xff]  ;;  %v897_v28 = vshrl.u32 %v2203_v20, 16  ;;  %v900_v30 = vshll.u32 %v2203_v20, 16  ;;  %v2025_v35 = vld [vmem:[%s2728_s6] sm:$0xf] }
  0x2e   : > { %688 = vmatmul.bf16.vlgmr.msra.gmra.mxu2 %v624_v46  ;;  %1616 = vmatpush.bf16.msrb.mxu3 %v2605_v2  ;;  %v349_v46 = vunpack.c.l.b16 %v272_v33  ;;  %v871_v48 = vrot.slane %v869_v29, 4  ;;  %v625_v2 = vpack.c.b16 %v619_v52, %v618_v51  ;;  %v890_v18 = vrot.slane %v889_v3, 4  ;;  %v2570_v38 = vld [vmem:[%s3304_s1 + $0x100] sm:$0xff]  ;;  %v2560_v62 = vld [vmem:[%s2728_s6 + $0x2c] sm:$0xf0] }
  0x2f   : > { %v590_v27 = vsel %vm2775_vm5, %v2076_v15, %v589_v16  ;;  %v911_v31 = vshrl.u32 %v2205_v22, 16  ;;  %v914_v33 = vshll.u32 %v2205_v22, 16  ;;  %v2026_v54 = vor.u32 %v2530_v39, %v2025_v35  ;;  %v2207_v3 = vld [vmem:[%s2728_s6 + $0x28] sm:$0xf]  ;;  %v2590_v22 = vld [vmem:[%s3304_s1 + $0x180] sm:$0xff] }
  0x30   : > { %512 = vmatpush.bf16.msrb.mxu1 %v2540_v0  ;;  %1062 = vmatpush.bf16.msrb.mxu0 %v2576_v1  ;;  %v355_v61 = vpack.c.b16 %v349_v46, %v348_v45  ;;  %v875_v0 = vor.u32 %v874_v50, %v871_v48  ;;  %v544_v1 = vld [vmem:[%s2728_s6 + $0x20] sm:$0xe]  ;;  %v2977_v45 = vld [vmem:[%s2728_s6 + $0x1c] sm:$0x1]  ;;  %v2980_v46 = vld [vmem:[%s2728_s6 + $0x24] sm:$0x1] }
  0x31   : > { %1371 = vmatpush.bf16.msrb.mxu2 %v2596_v6  ;;  %v2536_v6 = vld [vmem:[%s3304_s1 + $0x10] sm:$0xff]  ;;  %v2075_v11 = vrot.slane %v544_v1, 9  ;;  %v899_v48 = vrot.slane %v897_v28, 4  ;;  %v902_v50 = vrot.slane %v900_v30, 5  ;;  %v913_v51 = vrot.slane %v911_v31, 4  ;;  %v3009_v15 = vld [vmem:[%s3304_s1 + $0x228] sm:$0xff] }
  0x32   : > { %1617 = vmatpush.bf16.msrb.mxu3 %v2604_v24  ;;  %v876_v13 = vrot.slane %v875_v0, 4  ;;  %v2601_v24 = vld [vmem:[%s3304_s1 + $0x1d8] sm:$0xff]  ;;  %v916_v52 = vrot.slane %v914_v33, 5  ;;  %v920_v59 = vshll.u32 %v2980_v46, 16  ;;  %v2993_v1 = vld [vmem:[%s3304_s1 + $0x230] sm:$0xff]  ;;  %v925_v16 = vshrl.u32 %v2207_v3, 16 }
  0x33   : > { %v903_v63 = vor.u32 %v902_v50, %v899_v48  ;;  %v593_v20 = vrot.slane %v2822_v32, 5  ;;  %v2599_v32 = vld [vmem:[%s3304_s1 + $0x1c8] sm:$0xff]  ;;  %v3033_v28 = vld [vmem:[%s3304_s1 + $0x220] sm:$0xff]  ;;  %v2581_v31 = vld [vmem:[%s3304_s1 + $0x158] sm:$0xff] }
  0x34   : > { %513 = vmatpush.bf16.msrb.mxu1 %v2539_v19  ;;  %1063 = vmatpush.bf16.msrb.mxu0 %v2575_v25  ;;  %v894_v19 = vrot.slane %v892_v4, 5  ;;  %v881_v25 = vsel %vm2766_vm4, %v876_v13, %v880_v9  ;;  %v917_v0 = vor.u32 %v916_v52, %v913_v51  ;;  %v546_v4 = vld [vmem:[%s2728_s6 + $0x30] sm:$0xe]  ;;  %v922_v9 = vrot.slane %v920_v59, 5  ;;  %v3043_v33 = vld [vmem:[%s2728_s6 + $0x2c] sm:$0x1] }
  0x35   : > { %1372 = vmatpush.bf16.msrb.mxu2 %v2595_v26  ;;  %v586_v26 = vsel %vm2775_vm5, %v2075_v11, %v585_v14  ;;  %v2209_v11 = vld [vmem:[%s2728_s6 + $0x30] sm:$0xf]  ;;  %v904_v13 = vrot.slane %v903_v63, 4  ;;  %v3046_v39 = vld [vmem:[%s2728_s6 + $0x34] sm:$0x1]  ;;  %v934_v52 = vshll.u32 %v3043_v33, 16 }
  0x36   : > { %1618 = vmatpush.bf16.msrb.mxu3 %v2603_v40  ;;  %v895_v29 = vsel %vm2766_vm4, %v890_v18, %v894_v19  ;;  %v997_v40 = vunpack.c.l.b16 %v881_v25  ;;  %v620_v42 = vunpack.c.l.b16 %v586_v26  ;;  %v918_v14 = vrot.slane %v917_v0, 4  ;;  %v2600_v18 = vld [vmem:[%s3304_s1 + $0x1d0] sm:$0xff]  ;;  %v2401_v51 = vld [vmem:[%s2728_s6 + $0x18] sm:$0xf]  ;;  %v2561_v63 = vld [vmem:[%s2728_s6 + $0x3c] sm:$0xf0] }
  0x37   : > { %v998_v41 = vunpack.c.l.b16 %v895_v29  ;;  %v2077_v19 = vrot.slane %v546_v4, 9  ;;  %v927_v26 = vrot.slane %v925_v16, 4  ;;  %v948_v59 = vshll.u32 %v3046_v39, 16  ;;  %v2211_v0 = vld [vmem:[%s2728_s6 + $0x38] sm:$0xf] }
  0x38   : > { %514 = vmatpush.bf16.msrb.mxu1 %v2538_v37  ;;  %1064 = vmatpush.bf16.msrb.mxu0 %v2574_v43  ;;  %v2585_v37 = vld [vmem:[%s3304_s1 + $0x178] sm:$0xff]  ;;  %v621_v43 = vunpack.c.l.b16 %v590_v27  ;;  %v923_v25 = vsel %vm2766_vm4, %v918_v14, %v922_v9 }
  0x39   : > { %1373 = vmatpush.bf16.msrb.mxu2 %v2594_v44  ;;  %v2974_v44 = vld [vmem:[%s3304_s1 + $0x238] sm:$0xff]  ;;  %v594_v29 = vsel %vm2775_vm5, %v2077_v19, %v593_v20  ;;  %v950_v16 = vrot.slane %v948_v59, 5  ;;  %v2598_v20 = vld [vmem:[%s3304_s1 + $0x1c0] sm:$0xff] }
  0x3a   : > { %1619 = vmatpush.bf16.msrb.mxu3 %v2602_v21  ;;  %v2078_v21 = vrot.slane %v547_v5, 9  ;;  %v3064_v5 = vld [vmem:[%s2728_s6 + $0x14] sm:$0x1]  ;;  %v3076_v19 = vld [vmem:[%s3304_s1 + $0x218] sm:$0xff] }
  0x3b   : > { %433 = vmatmul.bf16.gmra.mxu1 %v357_v60  ;;  %423 = vmatmul.bf16.gmra.mxu0 %v355_v61  ;;  %v626_v60 = vpack.c.b16 %v621_v43, %v620_v42  ;;  %v2161_v61 = vld [vmem:[%s2728_s6 + $0x28] sm:$0xf]  ;;  %v2531_v42 = vld [vmem:[%s2728_s6 + $0x14] sm:$0xf0]  ;;  %v622_v43 = vunpack.c.l.b16 %v594_v29 }
  0x3c   : > { %515 = vmatpush.bf16.msrb.mxu1 %v2537_v55  ;;  %1065 = vmatpush.bf16.msrb.mxu0 %v2573_v58  ;;  %v1005_v55 = vpack.c.b16 %v998_v41, %v997_v40  ;;  %v906_v58 = vshll.u32 %v2977_v45, 16  ;;  %v2399_v40 = vld [vmem:[%s2728_s6 + $0x10] sm:$0xf]  ;;  %v2263_v29 = vld [vmem:[%s2728_s6 + $0x8] sm:$0xe] }
  0x3d   : > { %1374 = vmatpush.bf16.msrb.mxu2 %v2593_v17  ;;  %828 = vmatmul.bf16.gmra.mxu3 %v2158_v8  ;;  %v928_v17 = vshll.u32 %v2207_v3, 16  ;;  %v2029_v41 = vld [vmem:[%s2728_s6 + $0x10] sm:$0xf] }
  0x3e   : > { %693 = vmatmul.bf16.gmra.mxu2 %v625_v2  ;;  %1620 = vmatpush.bf16.msrb.mxu3 %v2601_v24  ;;  %v2583_v2 = vld [vmem:[%s3304_s1 + $0x168] sm:$0xff]  ;;  %v908_v8 = vrot.slane %v906_v58, 5  ;;  %v942_v24 = vshll.u32 %v2209_v11, 16 }
  0x3f   : > { %v930_v27 = vrot.slane %v928_v17, 5  ;;  %v2213_v17 = vld [vmem:[%s2728_s6 + $0x40] sm:$0xf] }
  0x40   : > { %516 = vmatpush.bf16.msrb.mxu1 %v2536_v6  ;;  %1066 = vmatpush.bf16.msrb.mxu0 %v2572_v7  ;;  %v2591_v6 = vld [vmem:[%s3304_s1 + $0x188] sm:$0xff]  ;;  %v2162_v7 = vor.u32 %v2560_v62, %v2161_v61  ;;  %v944_v35 = vrot.slane %v942_v24, 5  ;;  %v2030_v61 = vor.u32 %v2531_v42, %v2029_v41  ;;  %v3102_v42 = vld [vmem:[%s2728_s6 + $0x3c] sm:$0x1] }
  0x41   : > { %1375 = vmatpush.bf16.msrb.mxu2 %v2592_v23  ;;  %v939_v23 = vshrl.u32 %v2209_v11, 16  ;;  %v931_v50 = vor.u32 %v930_v27, %v927_v26  ;;  %v3089_v27 = vld [vmem:[%s3304_s1 + $0x210] sm:$0xff] }
  0x42   : > { %1621 = vmatpush.bf16.msrb.mxu3 %v2600_v18  ;;  %v953_v18 = vshrl.u32 %v2211_v0, 16 }
  0x43   : > { %v932_v4 = vrot.slane %v931_v50, 4 }
  0x44   : > { %517 = vmatpush.bf16.msrb.mxu1 %v2535_v10  ;;  %1067 = vmatpush.bf16.msrb.mxu0 %v2571_v12  ;;  %v597_v10 = vrot.slane %v2825_v36, 5  ;;  %v2582_v12 = vld [vmem:[%s3304_s1 + $0x160] sm:$0xff]  ;;  %v909_v36 = vsel %vm2766_vm4, %v904_v13, %v908_v8 }
  0x45   : > { %1376 = vmatpush.bf16.msrb.mxu2 %v2591_v6  ;;  %v936_v6 = vrot.slane %v934_v52, 5 }
  0x46   : > { %v598_v30 = vsel %vm2775_vm5, %v2078_v21, %v597_v10  ;;  %1622 = vmatpush.bf16.msrb.mxu3 %v2599_v32  ;;  %v956_v21 = vshll.u32 %v2211_v0, 16  ;;  %v1128_v32 = vrot.slane %v2913_v56, 5  ;;  %v955_v56 = vrot.slane %v953_v18, 4 }
  0x47   : > { %v623_v48 = vunpack.c.l.b16 %v598_v30 }
  0x48   : > { %518 = vmatpush.bf16.msrb.mxu1 %v2534_v34  ;;  %1068 = vmatpush.bf16.msrb.mxu0 %v2570_v38  ;;  %v941_v34 = vrot.slane %v939_v23, 4  ;;  %v1000_v38 = vunpack.c.l.b16 %v923_v25  ;;  %v1124_v23 = vrot.slane %v2907_v47, 5  ;;  %v970_v25 = vshll.u32 %v2213_v17, 16 }
  0x49   : > { %1377 = vmatpush.bf16.msrb.mxu2 %v2590_v22  ;;  %v627_v3 = vpack.c.b16 %v623_v48, %v622_v43  ;;  %v1433_v22 = vshll.u32 %v3064_v5, 16  ;;  %v937_v47 = vsel %vm2766_vm4, %v932_v4, %v936_v6  ;;  %v2353_v4 = vld [vmem:[%s2728_s6 + $0x10] sm:$0xf] }
  0x4a   : > { %v945_v58 = vor.u32 %v944_v35, %v941_v34  ;;  %1623 = vmatpush.bf16.msrb.mxu3 %v2598_v20  ;;  %v2264_v34 = vld [vmem:[%s2728_s6 + $0x10] sm:$0xe]  ;;  %v2271_v35 = vrot.slane %v2263_v29, 9  ;;  %v972_v52 = vrot.slane %v970_v25, 5 }
  0x4b   : > { %519 = vmatmul.bf16.vlgmr.msrb.gmra.mxu1 %v2026_v54  ;;  %1069 = vmatmul.bf16.vlgmr.msrb.gmra.mxu0 %v1005_v55  ;;  %v1427_v54 = vshll.u32 %v2399_v40, 16  ;;  %v1438_v55 = vshrl.u32 %v2401_v51, 16  ;;  %v2272_v41 = vrot.slane %v2264_v34, 9  ;;  %v2606_v34 = vld [vmem:[%s3304_s1 + $0x200] sm:$0xff] }
  0x4c   : > { %1235 = vmatpush.bf16.msra.mxu1 %v2585_v37  ;;  %1790 = vmatpush.bf16.msra.mxu0 %v2974_v44  ;;  %v999_v37 = vunpack.c.l.b16 %v909_v36  ;;  %v946_v14 = vrot.slane %v945_v58, 4  ;;  %v967_v36 = vshrl.u32 %v2213_v17, 16  ;;  %v1125_v50 = vsel %vm2775_vm5, %v2271_v35, %v1124_v23  ;;  %v3135_v23 = vld [vmem:[%s2728_s6 + $0x2c] sm:$0x1] }
  0x4d   : > { %833 = vmatmul.bf16.gmra.mxu3 %v2162_v7  ;;  %2645 = vmatpush.bf16.msra.mxu2 %v2974_v44  ;;  %v2165_v44 = vld [vmem:[%s2728_s6 + $0x38] sm:$0xf]  ;;  %v3067_v7 = vld [vmem:[%s2728_s6 + $0x1c] sm:$0x1]  ;;  %v1429_v9 = vrot.slane %v1427_v54, 5  ;;  %v1440_v11 = vrot.slane %v1438_v55, 4  ;;  %v1171_v54 = vunpack.c.l.b16 %v1125_v50  ;;  %v1001_v58 = vunpack.c.l.b16 %v937_v47 }
  0x4e   : > { %698 = vmatmul.bf16.gmra.mxu2 %v626_v60  ;;  %v2580_v60 = vld [vmem:[%s3304_s1 + $0x150] sm:$0xff]  ;;  %v1006_v62 = vpack.c.b16 %v1000_v38, %v999_v37  ;;  %v2166_v13 = vor.u32 %v2561_v63, %v2165_v44  ;;  %v1447_v24 = vshll.u32 %v3067_v7, 16  ;;  %v951_v30 = vsel %vm2766_vm4, %v946_v14, %v950_v16  ;;  %v2033_v55 = vld [vmem:[%s2728_s6 + $0x20] sm:$0xf]  ;;  %v2532_v44 = vld [vmem:[%s2728_s6 + $0x24] sm:$0xf0] }
  0x4f   : > { %v958_v37 = vrot.slane %v956_v21, 5  ;;  %v1002_v59 = vunpack.c.l.b16 %v951_v30  ;;  %v962_v63 = vshll.u32 %v3102_v42, 16  ;;  %v2034_v18 = vor.u32 %v2532_v44, %v2033_v55  ;;  %v2037_v55 = vld [vmem:[%s2728_s6 + $0x30] sm:$0xf] }
  0x50   : > { %1236 = vmatpush.bf16.msra.mxu1 %v2584_v53  ;;  %1791 = vmatpush.bf16.msra.mxu0 %v2993_v1  ;;  %v1424_v53 = vshrl.u32 %v2399_v40, 16  ;;  %v1435_v40 = vrot.slane %v1433_v22, 5  ;;  %v1449_v48 = vrot.slane %v1447_v24, 5 }
  0x51   : > { %2646 = vmatpush.bf16.msra.mxu2 %v2993_v1  ;;  %v2579_v1 = vld [vmem:[%s3304_s1 + $0x148] sm:$0xff] }
  0x52   : > { %v1426_v8 = vrot.slane %v1424_v53, 4  ;;  %v1129_v53 = vsel %vm2775_vm5, %v2272_v41, %v1128_v32 }
  0x54   : > { %1237 = vmatpush.bf16.msra.mxu1 %v2583_v2  ;;  %1792 = vmatpush.bf16.msra.mxu0 %v3009_v15  ;;  %v1441_v2 = vshll.u32 %v2401_v51, 16  ;;  %v1430_v10 = vor.u32 %v1429_v9, %v1426_v8  ;;  %v969_v51 = vrot.slane %v967_v36, 4 }
  0x55   : > { %2647 = vmatpush.bf16.msra.mxu2 %v3009_v15  ;;  %v2607_v15 = vld [vmem:[%s3304_s1 + $0x208] sm:$0xff] }
  0x56   : > { %v1431_v38 = vrot.slane %v1430_v10, 4 }
  0x58   : > { %1238 = vmatpush.bf16.msra.mxu1 %v2582_v12  ;;  %1793 = vmatpush.bf16.msra.mxu0 %v3033_v28  ;;  %v1443_v12 = vrot.slane %v1441_v2, 5  ;;  %v1436_v0 = vsel %vm2766_vm4, %v1431_v38, %v1435_v40  ;;  %v2403_v2 = vld [vmem:[%s2728_s6 + $0x20] sm:$0xf] }
  0x59   : > { %2648 = vmatpush.bf16.msra.mxu2 %v3033_v28  ;;  %v1452_v9 = vshrl.u32 %v2403_v2, 16  ;;  %v973_v28 = vor.u32 %v972_v52, %v969_v51  ;;  %v1552_v10 = vunpack.c.l.b16 %v1436_v0  ;;  %v2266_v38 = vld [vmem:[%s2728_s6 + $0x20] sm:$0xe]  ;;  %v1132_v52 = vrot.slane %v2977_v45, 5 }
  0x5a   : > { %v1444_v26 = vor.u32 %v1443_v12, %v1440_v11  ;;  %v1455_v11 = vshll.u32 %v2403_v2, 16  ;;  %v3132_v12 = vld [vmem:[%s2728_s6 + $0x24] sm:$0x1] }
  0x5b   : > { %524 = vmatmul.bf16.gmra.mxu1 %v2030_v61  ;;  %1074 = vmatmul.bf16.gmra.mxu0 %v1006_v62  ;;  %v1172_v61 = vunpack.c.l.b16 %v1129_v53  ;;  %v959_v62 = vor.u32 %v958_v37, %v955_v56  ;;  %v1454_v20 = vrot.slane %v1452_v9, 4  ;;  %v974_v29 = vrot.slane %v973_v28, 4  ;;  %v2265_v37 = vld [vmem:[%s2728_s6 + $0x18] sm:$0xe] }
  0x5c   : > { %1239 = vmatpush.bf16.msra.mxu1 %v2581_v31  ;;  %1794 = vmatpush.bf16.msra.mxu0 %v3076_v19  ;;  %v2578_v31 = vld [vmem:[%s3304_s1 + $0x140] sm:$0xff]  ;;  %v1445_v43 = vrot.slane %v1444_v26, 4  ;;  %v1457_v21 = vrot.slane %v1455_v11, 5  ;;  %v964_v26 = vrot.slane %v962_v63, 5  ;;  %v1461_v56 = vshll.u32 %v3132_v12, 16 }
  0x5d   : > { %838 = vmatmul.bf16.gmra.mxu3 %v2166_v13  ;;  %v3126_v8 = vpack.c.b16 %v1172_v61, %v1171_v54  ;;  %v2586_v13 = vld [vmem:[%s2728_s6 + $0x14] sm:$0xf0]  ;;  %2649 = vmatpush.bf16.msra.mxu2 %v3076_v19  ;;  %v960_v25 = vrot.slane %v959_v62, 4  ;;  %v1475_v19 = vshll.u32 %v3135_v23, 16  ;;  %v2273_v50 = vrot.slane %v2265_v37, 9 }
  0x5e   : > { %703 = vmatmul.bf16.gmra.mxu2 %v627_v3  ;;  %v2405_v3 = vld [vmem:[%s2728_s6 + $0x28] sm:$0xf]  ;;  %v1450_v6 = vsel %vm2766_vm4, %v1445_v43, %v1449_v48  ;;  %v2354_v36 = vor.u32 %v2586_v13, %v2353_v4  ;;  %v1458_v30 = vor.u32 %v1457_v21, %v1454_v20  ;;  %v1463_v43 = vrot.slane %v1461_v56, 5  ;;  %v2463_v63 = vld [vmem:[%s2728_s6 + $0x10] sm:$0xe] }
  0x5f   : > { %v1466_v16 = vshrl.u32 %v2405_v3, 16  ;;  %v1469_v17 = vshll.u32 %v2405_v3, 16  ;;  %v1553_v22 = vunpack.c.l.b16 %v1450_v6  ;;  %v965_v40 = vsel %vm2766_vm4, %v960_v25, %v964_v26  ;;  %v2464_v3 = vld [vmem:[%s2728_s6 + $0x18] sm:$0xe]  ;;  %v2407_v4 = vld [vmem:[%s2728_s6 + $0x30] sm:$0xf] }
  0x60   : > { %1240 = vmatpush.bf16.msra.mxu1 %v2580_v60  ;;  %1795 = vmatpush.bf16.msra.mxu0 %v3089_v27  ;;  %v3115_v60 = vld [vmem:[%s2728_s6 + $0x44] sm:$0x1]  ;;  %v1477_v48 = vrot.slane %v1475_v19, 5  ;;  %v2274_v53 = vrot.slane %v2266_v38, 9  ;;  %v1136_v54 = vrot.slane %v2980_v46, 5  ;;  %v1003_v44 = vunpack.c.l.b16 %v965_v40 }
  0x61   : > { %v976_v14 = vshll.u32 %v3115_v60, 16  ;;  %v1468_v24 = vrot.slane %v1466_v16, 4  ;;  %v1471_v32 = vrot.slane %v1469_v17, 5  ;;  %2650 = vmatpush.bf16.msra.mxu2 %v3089_v27  ;;  %v1459_v27 = vrot.slane %v1458_v30, 4  ;;  %v2409_v6 = vld [vmem:[%s2728_s6 + $0x38] sm:$0xf] }
  0x62   : > { %v1137_v61 = vsel %vm2775_vm5, %v2274_v53, %v1136_v54  ;;  %v1679_v62 = vrot.slane %v3064_v5, 5  ;;  %v1480_v11 = vshrl.u32 %v2407_v4, 16  ;;  %v1483_v13 = vshll.u32 %v2407_v4, 16  ;;  %v2357_v17 = vld [vmem:[%s2728_s6 + $0x20] sm:$0xf] }
  0x63   : > { %v978_v47 = vrot.slane %v976_v14, 5  ;;  %v1472_v35 = vor.u32 %v1471_v32, %v1468_v24  ;;  %v1174_v0 = vunpack.c.l.b16 %v1137_v61  ;;  %v1464_v46 = vsel %vm2766_vm4, %v1459_v27, %v1463_v43  ;;  %v2267_v53 = vld [vmem:[%s2728_s6 + $0x28] sm:$0xe]  ;;  %v2268_v54 = vld [vmem:[%s2728_s6 + $0x30] sm:$0xe] }
  0x64   : > { %1241 = vmatpush.bf16.msra.mxu1 %v2579_v1  ;;  %1796 = vmatpush.bf16.msra.mxu0 %v2607_v15  ;;  %v1007_v1 = vpack.c.b16 %v1002_v59, %v1001_v58  ;;  %v1133_v59 = vsel %vm2775_vm5, %v2273_v50, %v1132_v52  ;;  %v1494_v5 = vshrl.u32 %v2409_v6, 16  ;;  %v1683_v16 = vrot.slane %v3067_v7, 5  ;;  %v2361_v50 = vld [vmem:[%s2728_s6 + $0x30] sm:$0xf]  ;;  %v2465_v4 = vld [vmem:[%s2728_s6 + $0x20] sm:$0xe] }
  0x65   : > { %v979_v41 = vsel %vm2766_vm4, %v974_v29, %v978_v47  ;;  %2651 = vmatpush.bf16.msra.mxu2 %v2607_v15  ;;  %v1473_v51 = vrot.slane %v1472_v35, 4  ;;  %v2533_v15 = vld [vmem:[%s2728_s6 + $0x34] sm:$0xf0]  ;;  %v1173_v45 = vunpack.c.l.b16 %v1133_v59  ;;  %v1554_v20 = vunpack.c.l.b16 %v1464_v46  ;;  %v3172_v29 = vld [vmem:[%s2728_s6 + $0x34] sm:$0x1] }
  0x66   : > { %v1004_v58 = vunpack.c.l.b16 %v979_v41  ;;  %v2038_v28 = vor.u32 %v2533_v15, %v2037_v55  ;;  %v1482_v24 = vrot.slane %v1480_v11, 4  ;;  %v1485_v32 = vrot.slane %v1483_v13, 5  ;;  %v3175_v47 = vld [vmem:[%s2728_s6 + $0x3c] sm:$0x1]  ;;  %v2411_v55 = vld [vmem:[%s2728_s6 + $0x40] sm:$0xf] }
  0x67   : > { %v1478_v2 = vsel %vm2766_vm4, %v1473_v51, %v1477_v48  ;;  %v3166_v9 = vpack.c.b16 %v1174_v0, %v1173_v45  ;;  %v1503_v35 = vshll.u32 %v3175_v47, 16  ;;  %v2276_v59 = vrot.slane %v2268_v54, 9  ;;  %v2413_v15 = vld [vmem:[%s2728_s6 + $0x48] sm:$0xf] }
  0x68   : > { %1242 = vmatpush.bf16.msra.mxu1 %v2578_v31  ;;  %v1560_v31 = vpack.c.b16 %v1553_v22, %v1552_v10  ;;  %1797 = vmatpush.bf16.msra.mxu0 %v2606_v34  ;;  %v1008_v14 = vpack.c.b16 %v1004_v58, %v1003_v44  ;;  %v1555_v21 = vunpack.c.l.b16 %v1478_v2  ;;  %v2471_v10 = vrot.slane %v2463_v63, 9  ;;  %v2466_v11 = vld [vmem:[%s2728_s6 + $0x28] sm:$0xe] }
  0x69   : > { %2652 = vmatpush.bf16.msra.mxu2 %v2606_v34  ;;  %v2472_v22 = vrot.slane %v2464_v3, 9  ;;  %v1486_v19 = vor.u32 %v1485_v32, %v1482_v24  ;;  %v1505_v43 = vrot.slane %v1503_v35, 5  ;;  %v2275_v44 = vrot.slane %v2267_v53, 9 }
  0x6a   : > { %v1561_v30 = vpack.c.b16 %v1555_v21, %v1554_v20  ;;  %v1680_v7 = vsel %vm2775_vm5, %v2471_v10, %v1679_v62  ;;  %v1140_v58 = vrot.slane %v3043_v33, 5  ;;  %v1144_v61 = vrot.slane %v3046_v39, 5  ;;  %v2588_v62 = vld [vmem:[%s2728_s6 + $0x34] sm:$0xf0] }
  0x6b   : > { %529 = vmatmul.bf16.gmra.mxu1 %v2034_v18  ;;  %1079 = vmatmul.bf16.gmra.mxu0 %v1007_v1  ;;  %v2587_v18 = vld [vmem:[%s2728_s6 + $0x24] sm:$0xf0]  ;;  %v1497_v1 = vshll.u32 %v2409_v6, 16  ;;  %v1684_v56 = vsel %vm2775_vm5, %v2472_v22, %v1683_v16  ;;  %v1726_v37 = vunpack.c.l.b16 %v1680_v7  ;;  %v1487_v40 = vrot.slane %v1486_v19, 4  ;;  %v3202_v16 = vld [vmem:[%s2728_s6 + $0x44] sm:$0x1] }
  0x6c   : > { %v2358_v26 = vor.u32 %v2587_v18, %v2357_v17  ;;  %v1727_v38 = vunpack.c.l.b16 %v1684_v56  ;;  %v1508_v63 = vshrl.u32 %v2411_v55, 16  ;;  %v1511_v45 = vshll.u32 %v2411_v55, 16  ;;  %v3205_v17 = vld [vmem:[%s2728_s6 + $0x4c] sm:$0x1] }
  0x6d   : > { %1624 = vmatmul.bf16.vlgmr.msrb.gmra.mxu3 %v1560_v31  ;;  %v1499_v25 = vrot.slane %v1497_v1, 5  ;;  %v1489_v31 = vshll.u32 %v3172_v29, 16  ;;  %v1522_v0 = vshrl.u32 %v2413_v15, 16  ;;  %v1525_v46 = vshll.u32 %v2413_v15, 16 }
  0x6e   : > { %1378 = vmatmul.bf16.vlgmr.msrb.gmra.mxu2 %v2354_v36  ;;  %v1496_v36 = vrot.slane %v1494_v5, 4  ;;  %v1734_v48 = vpack.c.b16 %v1727_v38, %v1726_v37  ;;  %v1141_v6 = vsel %vm2775_vm5, %v2275_v44, %v1140_v58  ;;  %v1145_v33 = vsel %vm2775_vm5, %v2276_v59, %v1144_v61  ;;  %v2269_v38 = vld [vmem:[%s2728_s6 + $0x38] sm:$0xe] }
  0x6f   : > { %v1491_v41 = vrot.slane %v1489_v31, 5  ;;  %v1175_v13 = vunpack.c.l.b16 %v1141_v6  ;;  %v1176_v39 = vunpack.c.l.b16 %v1145_v33  ;;  %v1510_v5 = vrot.slane %v1508_v63, 4  ;;  %v2468_v61 = vld [vmem:[%s2728_s6 + $0x38] sm:$0xe]  ;;  %v2470_v63 = vld [vmem:[%s2728_s6 + $0x48] sm:$0xe] }
  0x70   : > { %v1500_v34 = vor.u32 %v1499_v25, %v1496_v36  ;;  %v1524_v18 = vrot.slane %v1522_v0, 4  ;;  %v1527_v1 = vrot.slane %v1525_v46, 5  ;;  %v2473_v20 = vrot.slane %v2465_v4, 9 }
  0x71   : > { %v1492_v51 = vsel %vm2766_vm4, %v1487_v40, %v1491_v41  ;;  %v3207_v21 = vpack.c.b16 %v1176_v39, %v1175_v13  ;;  %v1687_v22 = vrot.slane %v3132_v12, 5  ;;  %v2474_v24 = vrot.slane %v2466_v11, 9  ;;  %v2270_v40 = vld [vmem:[%s2728_s6 + $0x40] sm:$0xe] }
  0x72   : > { %v1501_v27 = vrot.slane %v1500_v34, 4  ;;  %v1556_v2 = vunpack.c.l.b16 %v1492_v51  ;;  %v1691_v32 = vrot.slane %v3135_v23, 5  ;;  %v1517_v25 = vshll.u32 %v3202_v16, 16  ;;  %v2589_v51 = vld [vmem:[%s2728_s6 + $0x44] sm:$0xf0] }
  0x73   : > { %v1688_v7 = vsel %vm2775_vm5, %v2473_v20, %v1687_v22  ;;  %v2277_v41 = vrot.slane %v2269_v38, 9  ;;  %v1695_v0 = vrot.slane %v3172_v29, 5  ;;  %v2476_v46 = vrot.slane %v2468_v61, 9 }
  0x74   : > { %v1506_v52 = vsel %vm2766_vm4, %v1501_v27, %v1505_v43  ;;  %v1692_v12 = vsel %vm2775_vm5, %v2474_v24, %v1691_v32  ;;  %v1519_v23 = vrot.slane %v1517_v25, 5  ;;  %v1728_v31 = vunpack.c.l.b16 %v1688_v7 }
  0x75   : > { %v1557_v3 = vunpack.c.l.b16 %v1506_v52  ;;  %v1729_v34 = vunpack.c.l.b16 %v1692_v12  ;;  %v1148_v27 = vrot.slane %v3102_v42, 5  ;;  %v2278_v43 = vrot.slane %v2270_v40, 9  ;;  %v2467_v42 = vld [vmem:[%s2728_s6 + $0x30] sm:$0xe] }
  0x76   : > { %v1707_v4 = vrot.slane %v3205_v17, 5  ;;  %v2478_v33 = vrot.slane %v2470_v63, 9 }
  0x77   : > { %v1562_v10 = vpack.c.b16 %v1557_v3, %v1556_v2  ;;  %v1735_v52 = vpack.c.b16 %v1729_v34, %v1728_v31  ;;  %v1149_v53 = vsel %vm2775_vm5, %v2277_v41, %v1148_v27  ;;  %v1699_v2 = vrot.slane %v3175_v47, 5 }
  0x78   : > { %v1177_v44 = vunpack.c.l.b16 %v1149_v53  ;;  %v1703_v3 = vrot.slane %v3202_v16, 5  ;;  %v1708_v29 = vsel %vm2775_vm5, %v2478_v33, %v1707_v4 }
  0x7b   : > { %534 = vmatmul.bf16.gmra.mxu1 %v2038_v28  ;;  %1084 = vmatmul.bf16.gmra.mxu0 %v1008_v14  ;;  %v1513_v28 = vrot.slane %v1511_v45, 5  ;;  %v2362_v14 = vor.u32 %v2588_v62, %v2361_v50  ;;  %v2365_v50 = vld [vmem:[%s2728_s6 + $0x40] sm:$0xf]  ;;  %v2475_v45 = vrot.slane %v2467_v42, 9 }
  0x7c   : > { %v2366_v59 = vor.u32 %v2589_v51, %v2365_v50  ;;  %v2469_v62 = vld [vmem:[%s2728_s6 + $0x40] sm:$0xe]  ;;  %s2529_s6 = sshll.u32 %s3312_s13, 5 }
  0x7d   : > { %1629 = vmatmul.bf16.gmra.mxu3 %v1561_v30  ;;  %v1514_v36 = vor.u32 %v1513_v28, %v1510_v5  ;;  %v1531_v30 = vshll.u32 %v3205_v17, 16  ;;  %v2477_v6 = vrot.slane %v2469_v62, 9  ;;  %v1696_v11 = vsel %vm2775_vm5, %v2475_v45, %v1695_v0  ;;  %s3279_s19 = scalar_lea.vmem %s3305_s2, %s2529_s6 }
  0x7e   : > { %1383 = vmatmul.bf16.gmra.mxu2 %v2358_v26  ;;  %v1528_v26 = vor.u32 %v1527_v1, %v1524_v18  ;;  %v1730_v47 = vunpack.c.l.b16 %v1696_v11  ;;  %v1733_v28 = vunpack.c.l.b16 %v1708_v29 }
  0x7f   : > { %v1533_v19 = vrot.slane %v1531_v30, 5  ;;  %v1704_v13 = vsel %vm2775_vm5, %v2477_v6, %v1703_v3 }
  0x80   : > { %v1529_v56 = vrot.slane %v1528_v26, 4  ;;  %v1732_v5 = vunpack.c.l.b16 %v1704_v13 }
  0x82   : > { %v1534_v37 = vsel %vm2766_vm4, %v1529_v56, %v1533_v19  ;;  %v1737_v18 = vpack.c.b16 %v1733_v28, %v1732_v5 }
  0x83   : > { %v1559_v55 = vunpack.c.l.b16 %v1534_v37 }
  0x8b   : > { %1243 = vmatmul.bf16.vlgmr.msra.gmra.mxu1 %v3126_v8  ;;  %1798 = vmatmul.bf16.vlgmr.msra.gmra.mxu0 %v1734_v48  ;;  %v1515_v8 = vrot.slane %v1514_v36, 4  ;;  %v1152_v48 = vrot.slane %v3115_v60, 5 }
  0x8d   : > { %1634 = vmatmul.bf16.gmra.mxu3 %v1562_v10  ;;  %v1520_v35 = vsel %vm2766_vm4, %v1515_v8, %v1519_v23  ;;  %v1153_v49 = vsel %vm2775_vm5, %v2278_v43, %v1152_v48 }
  0x8e   : > { %1388 = vmatmul.bf16.gmra.mxu2 %v2362_v14  ;;  %v1558_v54 = vunpack.c.l.b16 %v1520_v35  ;;  %v1178_v58 = vunpack.c.l.b16 %v1153_v49 }
  0x90   : > { %v1182_v15 = vpack.c.b16 %v1178_v58, %v1177_v44  ;;  %v1563_v60 = vpack.c.b16 %v1559_v55, %v1558_v54 }
  0x9b   : > { %1248 = vmatmul.bf16.gmra.mxu1 %v3166_v9  ;;  %1803 = vmatmul.bf16.gmra.mxu0 %v1735_v52  ;;  %v1700_v9 = vsel %vm2775_vm5, %v2476_v46, %v1699_v2 }
  0x9c   : > { %v1731_v39 = vunpack.c.l.b16 %v1700_v9 }
  0x9d   : > { %1639 = vmatmul.bf16.gmra.mxu3 %v1563_v60 }
  0x9e   : > { %1393 = vmatmul.bf16.gmra.mxu2 %v2366_v59  ;;  %v1736_v14 = vpack.c.b16 %v1731_v39, %v1730_v47 }
  0xa8   : > { %v429_v16 = vpop.f32.mrf.mxu1  ;;  %v419_v17 = vpop.f32.mrf.mxu0 }
  0xab   : > { %1253 = vmatmul.bf16.gmra.mxu1 %v3207_v21  ;;  %1808 = vmatmul.bf16.gmra.mxu0 %v1736_v14 }
  0xae   : > { %1813 = vmatmul.bf16.vlgmr.msra.gmra.mxu2 %v1737_v18 }
  0xb0   : > { %v431_v20 = vpop.f32.mrf.mxu1  ;;  %v421_v10 = vpop.f32.mrf.mxu0 }
  0xb1   : > { %v689_v1 = vpop.f32.mrf.mxu2  ;;  %v824_v22 = vpop.f32.mrf.mxu3 }
  0xb8   : > { %v434_v32 = vpop.f32.mrf.mxu1  ;;  %v424_v57 = vpop.f32.mrf.mxu0 }
  0xb9   : > { %v691_v24 = vpop.f32.mrf.mxu2  ;;  %v3250_v36 = vpop.f32.mrf.mxu3 }
  0xbb   : > { %1258 = vmatmul.bf16.gmra.mxu1 %v1182_v15 }
  0xc0   : > { %v436_v26 = vpop.f32.mrf.mxu1  ;;  %v426_v30 = vpop.f32.mrf.mxu0 }
  0xc1   : > { %v694_v25 = vpop.f32.mrf.mxu2  ;;  %v829_v7 = vpop.f32.mrf.mxu3 }
  0xc8   : > { %v520_v8 = vpop.f32.mrf.mxu1  ;;  %v1070_v23 = vpop.f32.mrf.mxu0 }
  0xc9   : > { %v696_v12 = vpop.f32.mrf.mxu2  ;;  %v521_v21 = vadd.f32 %v520_v8, %v419_v17  ;;  %v3252_v19 = vpop.f32.mrf.mxu3 }
  0xcb   : > { %v709_v56 = vadd.f32 %v689_v1, %v521_v21 }
  0xcd   : > { %v844_v31 = vadd.f32 %v824_v22, %v709_v56 }
  0xcf   : > { %v1090_v34 = vadd.f32 %v1070_v23, %v844_v31 }
  0xd0   : > { %v522_v37 = vpop.f32.mrf.mxu1  ;;  %v1072_v38 = vpop.f32.mrf.mxu0 }
  0xd1   : > { %v699_v35 = vpop.f32.mrf.mxu2  ;;  %v523_v40 = vadd.f32 %v522_v37, %v421_v10  ;;  %v834_v27 = vpop.f32.mrf.mxu3 }
  0xd3   : > { %v710_v41 = vadd.f32 %v691_v24, %v523_v40 }
  0xd8   : > { %v525_v48 = vpop.f32.mrf.mxu1  ;;  %v1075_v50 = vpop.f32.mrf.mxu0 }
  0xd9   : > { %v701_v43 = vpop.f32.mrf.mxu2  ;;  %v526_v51 = vadd.f32 %v525_v48, %v424_v57  ;;  %v3254_v55 = vpop.f32.mrf.mxu3  ;;  %v845_v57 = vadd.f32 %v3250_v36, %v710_v41 }
  0xdb   : > { %v711_v52 = vadd.f32 %v694_v25, %v526_v51 }
  0xdd   : > { %v846_v53 = vadd.f32 %v829_v7, %v711_v52 }
  0xdf   : > { %v1092_v49 = vadd.f32 %v1075_v50, %v846_v53 }
  0xe0   : > { %v527_v44 = vpop.f32.mrf.mxu1  ;;  %v1077_v58 = vpop.f32.mrf.mxu0 }
  0xe1   : > { %v704_v54 = vpop.f32.mrf.mxu2  ;;  %v528_v59 = vadd.f32 %v527_v44, %v426_v30  ;;  %v3256_v60 = vpop.f32.mrf.mxu3 }
  0xe3   : > { %v712_v42 = vadd.f32 %v696_v12, %v528_v59 }
  0xe8   : > { %v530_v15 = vpop.f32.mrf.mxu1  ;;  %v1080_v62 = vpop.f32.mrf.mxu0 }
  0xe9   : > { %v706_v61 = vpop.f32.mrf.mxu2  ;;  %v531_v63 = vadd.f32 %v530_v15, %v429_v16  ;;  %v3264_v11 = vpop.f32.mrf.mxu3 }
  0xeb   : > { %v713_v45 = vadd.f32 %v699_v35, %v531_v63 }
  0xed   : > { %v848_v0 = vadd.f32 %v834_v27, %v713_v45 }
  0xef   : > { %v3258_v46 = vadd.f32 %v1080_v62, %v848_v0 }
  0xf0   : > { %v532_v3 = vpop.f32.mrf.mxu1  ;;  %v3260_v4 = vpop.f32.mrf.mxu0 }
  0xf1   : > { %v1379_v2 = vpop.f32.mrf.mxu2  ;;  %v533_v6 = vadd.f32 %v532_v3, %v431_v20  ;;  %v1625_v5 = vpop.f32.mrf.mxu3 }
  0xf3   : > { %v3262_v33 = vadd.f32 %v701_v43, %v533_v6  ;;  %v847_v43 = vadd.f32 %v3252_v19, %v712_v42 }
  0xf8   : > { %v535_v13 = vpop.f32.mrf.mxu1  ;;  %v3266_v29 = vpop.f32.mrf.mxu0 }
  0xf9   : > { %v1381_v9 = vpop.f32.mrf.mxu2  ;;  %v536_v47 = vadd.f32 %v535_v13, %v434_v32  ;;  %v1627_v1 = vpop.f32.mrf.mxu3  ;;  %v1091_v32 = vadd.f32 %v1072_v38, %v845_v57 }
  0xfb   : > { %v3268_v39 = vadd.f32 %v704_v54, %v536_v47  ;;  %v1093_v54 = vadd.f32 %v1077_v58, %v847_v43 }
 0x100   : > { %v537_v14 = vpop.f32.mrf.mxu1  ;;  %v3270_v16 = vpop.f32.mrf.mxu0 }
 0x101   : > { %v1384_v28 = vpop.f32.mrf.mxu2  ;;  %v538_v17 = vadd.f32 %v537_v14, %v436_v26  ;;  %v1630_v23 = vpop.f32.mrf.mxu3 }
 0x103   : > { %v3272_v18 = vadd.f32 %v706_v61, %v538_v17 }
 0x108   : > { %v1244_v20 = vpop.f32.mrf.mxu1  ;;  %v1799_v10 = vpop.f32.mrf.mxu0 }
 0x109   : > { %v1264_v22 = vadd.f32 %v1244_v20, %v1090_v34  ;;  %v1386_v24 = vpop.f32.mrf.mxu2  ;;  %v1632_v51 = vpop.f32.mrf.mxu3 }
 0x10b   : > { %v1399_v25 = vadd.f32 %v1379_v2, %v1264_v22 }
 0x10d   : > { %v1645_v30 = vadd.f32 %v1625_v5, %v1399_v25  ;;  %v849_v5 = vadd.f32 %v3254_v55, %v3262_v33 }
 0x10f   : > { %v1819_v56 = vadd.f32 %v1799_v10, %v1645_v30 }
 0x110   : > { %v1246_v7 = vpop.f32.mrf.mxu1  ;;  %v1801_v12 = vpop.f32.mrf.mxu0 }
 0x111   : > { %v1265_v8 = vadd.f32 %v1246_v7, %v1091_v32  ;;  %v1389_v26 = vpop.f32.mrf.mxu2  ;;  %v1856_v37 = vmul.f32 %v1819_v56, %v1819_v56 }
 0x113   : > { %v1400_v21 = vadd.f32 %v1381_v9, %v1265_v8 }
 0x115   : > { %v1646_v31 = vadd.f32 %v1627_v1, %v1400_v21  ;;  %v1095_v1 = vadd.f32 %v3260_v4, %v849_v5 }
 0x117   : > { %v1820_v35 = vadd.f32 %v1801_v12, %v1646_v31 }
 0x118   : > { %v1249_v36 = vpop.f32.mrf.mxu1  ;;  %v1804_v34 = vpop.f32.mrf.mxu0 }
 0x119   : > { %v2617_v38 = vpack.c.bf16 %v1820_v35, %v1819_v56  ;;  %v1843_v40 = vadd.f32 %v1820_v35, %v1819_v56  ;;  %v1857_v41 = vmul.f32 %v1820_v35, %v1820_v35  ;;  %v1266_v27 = vadd.f32 %v1249_v36, %v1092_v49  ;;  %v1391_v53 = vpop.f32.mrf.mxu2  ;;  %v1635_v49 = vpop.f32.mrf.mxu3 }
 0x11a   : > { %v851_v35 = vadd.f32 %v3264_v11, %v3272_v18 }
 0x11b   : > { %2618 = vst [vmem:[%s3279_s19] sm:$0xff] %v2617_v38   ;;  %v1864_v48 = vadd.f32 %v1857_v41, %v1856_v37  ;;  %v1401_v50 = vadd.f32 %v1384_v28, %v1266_v27 }
 0x11d   : > { %v1647_v52 = vadd.f32 %v1630_v23, %v1401_v50 }
 0x11f   : > { %v1821_v44 = vadd.f32 %v1804_v34, %v1647_v52  ;;  %v1097_v34 = vadd.f32 %v3270_v16, %v851_v35 }
 0x120   : > { %v1251_v59 = vpop.f32.mrf.mxu1  ;;  %v1806_v61 = vpop.f32.mrf.mxu0 }
 0x121   : > { %v1844_v15 = vadd.f32 %v1843_v40, %v1821_v44  ;;  %v1858_v62 = vmul.f32 %v1821_v44, %v1821_v44  ;;  %v1267_v63 = vadd.f32 %v1251_v59, %v1093_v54  ;;  %v1394_v19 = vpop.f32.mrf.mxu2  ;;  %v1637_v10 = vpop.f32.mrf.mxu3 }
 0x123   : > { %v1865_v45 = vadd.f32 %v1864_v48, %v1858_v62  ;;  %v1402_v0 = vadd.f32 %v1386_v24, %v1267_v63 }
 0x125   : > { %v1648_v2 = vadd.f32 %v1632_v51, %v1402_v0 }
 0x127   : > { %v1822_v3 = vadd.f32 %v1806_v61, %v1648_v2 }
 0x128   : > { %v1254_v42 = vpop.f32.mrf.mxu1  ;;  %v1809_v58 = vpop.f32.mrf.mxu0 }
 0x129   : > { %v2622_v6 = vpack.c.bf16 %v1822_v3, %v1821_v44  ;;  %v1845_v9 = vadd.f32 %v1844_v15, %v1822_v3  ;;  %v1859_v13 = vmul.f32 %v1822_v3, %v1822_v3  ;;  %v1268_v47 = vadd.f32 %v1254_v42, %v3258_v46  ;;  %v1396_v32 = vpop.f32.mrf.mxu2  ;;  %v1640_v31 = vpop.f32.mrf.mxu3 }
 0x12a   : > { %v850_v46 = vadd.f32 %v3256_v60, %v3268_v39 }
 0x12b   : > { %2634 = vst [vmem:[%s3279_s19 + $0x8] sm:$0xff] %v2622_v6   ;;  %v1866_v28 = vadd.f32 %v1865_v45, %v1859_v13  ;;  %v1403_v14 = vadd.f32 %v1389_v26, %v1268_v47 }
 0x12c   : > { %v1096_v12 = vadd.f32 %v3266_v29, %v850_v46 }
 0x12d   : > { %v1649_v17 = vadd.f32 %v1635_v49, %v1403_v14 }
 0x12f   : > { %v1823_v20 = vadd.f32 %v1809_v58, %v1649_v17 }
 0x130   : > { %v1256_v22 = vpop.f32.mrf.mxu1  ;;  %v1811_v55 = vpop.f32.mrf.mxu0 }
 0x131   : > { %v1846_v24 = vadd.f32 %v1845_v9, %v1823_v20  ;;  %v1860_v57 = vmul.f32 %v1823_v20, %v1823_v20  ;;  %v1269_v25 = vadd.f32 %v1256_v22, %v1095_v1  ;;  %v1814_v60 = vpop.f32.mrf.mxu2  ;;  %v1642_v50 = vpop.f32.mrf.mxu3 }
 0x133   : > { %v1867_v30 = vadd.f32 %v1866_v28, %v1860_v57  ;;  %v1404_v7 = vadd.f32 %v1391_v53, %v1269_v25 }
 0x135   : > { %v1650_v33 = vadd.f32 %v1637_v10, %v1404_v7 }
 0x137   : > { %v1824_v8 = vadd.f32 %v1811_v55, %v1650_v33 }
 0x138   : > { %v1259_v23 = vpop.f32.mrf.mxu1 }
 0x139   : > { %v2627_v4 = vpack.c.bf16 %v1824_v8, %v1823_v20  ;;  %v1847_v21 = vadd.f32 %v1846_v24, %v1824_v8  ;;  %v1861_v56 = vmul.f32 %v1824_v8, %v1824_v8  ;;  %v1270_v26 = vadd.f32 %v1259_v23, %v1096_v12  ;;  %v1816_v52 = vpop.f32.mrf.mxu2 }
 0x13b   : > { %2635 = vst [vmem:[%s3279_s19 + $0x10] sm:$0xff] %v2627_v4   ;;  %v1868_v37 = vadd.f32 %v1867_v30, %v1861_v56  ;;  %v1405_v36 = vadd.f32 %v1394_v19, %v1270_v26 }
 0x13d   : > { %v1651_v39 = vadd.f32 %v1640_v31, %v1405_v36 }
 0x13f   : > { %v1825_v38 = vadd.f32 %v1814_v60, %v1651_v39 }
 0x140   : > { %v1261_v29 = vpop.f32.mrf.mxu1 }
 0x141   : > { %v1848_v40 = vadd.f32 %v1847_v21, %v1825_v38  ;;  %v1862_v41 = vmul.f32 %v1825_v38, %v1825_v38  ;;  %v1271_v27 = vadd.f32 %v1261_v29, %v1097_v34 }
 0x143   : > { %v1869_v43 = vadd.f32 %v1868_v37, %v1862_v41  ;;  %v1406_v48 = vadd.f32 %v1396_v32, %v1271_v27 }
 0x145   : > { %v1652_v51 = vadd.f32 %v1642_v50, %v1406_v48 }
 0x147   : > { %v1826_v11 = vadd.f32 %v1816_v52, %v1652_v51 }
 0x149   : > { %v2632_v18 = vpack.c.bf16 %v1826_v11, %v1825_v38  ;;  %v1849_v53 = vadd.f32 %v1848_v40, %v1826_v11  ;;  %v1863_v54 = vmul.f32 %v1826_v11, %v1826_v11 }
 0x14b   : > { %2636 = vst [vmem:[%s3279_s19 + $0x18] sm:$0xff] %v2632_v18   ;;  %v1850_v44 = vrot.slane %v1849_v53, 4  ;;  %v1870_v59 = vadd.f32 %v1869_v43, %v1863_v54 }
 0x14d   : > { %v1851_v61 = vadd.f32 %v1850_v44, %v1849_v53  ;;  %v1871_v16 = vrot.slane %v1870_v59, 4 }
 0x14f   : > { %v1852_v15 = vrot.slane %v1851_v61, 2  ;;  %v1872_v62 = vadd.f32 %v1871_v16, %v1870_v59 }
 0x151   : > { %v1853_v63 = vadd.f32 %v1852_v15, %v1851_v61  ;;  %v1873_v45 = vrot.slane %v1872_v62, 2 }
 0x153   : > { %v1854_v0 = vrot.slane %v1853_v63, 1  ;;  %v1874_v2 = vadd.f32 %v1873_v45, %v1872_v62 }
 0x155   : > { %v1875_v49 = vrot.slane %v1874_v2, 1  ;;  %v1855_v3 = vadd.f32 %v1854_v0, %v1853_v63 }
 0x157   : > { %v1876_v19 = vadd.f32 %v1875_v49, %v1874_v2 }
 0x159   : > { %v1878_v42 = vsel %vm1877_vm6, %v1855_v3, %v1876_v19 }
 0x15a   : > { %1879 = vst [vmem:[%s181_s23] sm:$0x3] %v1878_v42 }
 0x15b PF: > { %s14_s12 = sadd.s32 1, %s2668_s12  }
 0x15c   : > { %p11_p4 = scmp.ge.s32.totalorder %s14_s12, 4  }
 0x15e   :  { %13 = sbr.rel (!%p11_p4) target bundleno = 1 (0x1), region = 80 }

</bundles_post_ra>
